<compile_context>
chip_gen: v7x
topology: tpu7x:2x2x1
jax: 0.10.0
libtpu: 0.0.40
codegen_flags: <defaults>
</compile_context>

<pallas_src>
import math
import jax
import jax.numpy as jnp
from jax import lax
from jax.experimental import pallas as pl
from jax.experimental.pallas import tpu as pltpu


def _sigmoid(x):
    return 1.0 / (1.0 + jnp.exp(-x))


def vsa_kernel(lf_pat_ref, hf_ref, w_lf_ref, w_hf_ref, c_ref,
               w_solo_ref, b_solo_ref, solo_ref, o_ref):
    G = hf_ref.shape[0]            # images handled this grid step
    P = w_solo_ref.shape[0]        # 256 pixels per image

    # LF branch: folded (conv3x3s4 ∘ 1x1s ∘ +mean) weights -> one bf16 MXU matmul
    # over all G images, f32 accumulation.  Only rows 0 (main) and 1 (attn) are live.
    lf_ma = jnp.dot(w_lf_ref[...], lf_pat_ref[...],
                    preferred_element_type=jnp.float32)                  # (8, G*P)

    atted_rows = []
    for g in range(G):                                                   # static unroll, G small
        # HF branch in natural (C, P) layout; cast is cheap VPU work hidden under DMA.
        hf_g = hf_ref[g].astype(jnp.bfloat16)                            # (hfc, P)
        hf_ma = jnp.dot(w_hf_ref[...], hf_g,
                        preferred_element_type=jnp.float32)              # (8, P)
        ma = lf_ma[:, g * P:(g + 1) * P] + hf_ma                         # (8, P)
        main_r = ma[0:1, :] + c_ref[0:1, :]                              # (1, P)
        attn_r = ma[1:2, :] + c_ref[1:2, :]                              # (1, P)
        atted_rows.append(main_r * _sigmoid(attn_r))                     # (1, P)

    pad = (-G) % 8                                                       # pad M to a sublane group
    if pad:
        atted_rows.append(jnp.zeros((pad, P), jnp.float32))
    atted = jnp.concatenate(atted_rows, axis=0) if len(atted_rows) > 1 else atted_rows[0]

    # solo attention: (>=G, 256) @ (256, E), f32
    logits = jnp.dot(atted, w_solo_ref[...],
                     preferred_element_type=jnp.float32) + b_solo_ref[...]
    solo_att = _sigmoid(logits)                                          # (>=G, E)

    for g in range(G):
        y = solo_ref[g] * solo_att[g:g + 1, :]                           # (1, E)
        norm = jnp.sqrt(jnp.sum(y * y, axis=-1, keepdims=True)) + 1e-8
        o_ref[g] = (y / norm).astype(o_ref.dtype)


def _extract_patches_t(x, ksize=3, stride=4):
    """im2col for a VALID conv, transposed and cast to bf16 in one fused pass:
    [B, C, H, W] -> [C*k*k, B*OH*OW]; row order (c, kh, kw), col order (b, oh, ow)."""
    B, C, H, W = x.shape
    OH = (H - ksize) // stride + 1
    OW = (W - ksize) // stride + 1
    cols = []
    for kh in range(ksize):
        for kw in range(ksize):
            cols.append(x[:, :,
                          kh:kh + stride * (OH - 1) + 1:stride,
                          kw:kw + stride * (OW - 1) + 1:stride])          # [B, C, OH, OW]
    pats = jnp.stack(cols, axis=2)                                        # [B, C, k*k, OH, OW]
    pats = pats.transpose(1, 2, 0, 3, 4)                                  # [C, k*k, B, OH, OW]
    return pats.reshape(C * ksize * ksize, B * OH * OW).astype(jnp.bfloat16), OH, OW


def vsa_pallas(lower_feature, higher_feature, solo_feature, params):
    (w_lf, b_lf, w_hf, b_hf, w1, b1, w2, b2, w_solo, b_solo) = params
    B = lower_feature.shape[0]
    CS = w_lf.shape[0]                                    # multiscale channel size
    E = w_solo.shape[0]                                   # embed dim
    hfc = w_hf.shape[1]                                   # 768
    kfl = w_lf.shape[1] * w_lf.shape[2] * w_lf.shape[3]   # 192*9

    assert w1.shape[0] == 1 and w2.shape[0] == 1, "weight folding assumes out_channels == 1"
    assert E % 128 == 0, "embed dim must be a multiple of 128 for lane-dense stores"

    # LF conv (3x3, s=4) as im2col matmul; patches staged transposed + bf16 (one fused pass)
    lf_pat_t, OH, OW = _extract_patches_t(lower_feature, 3, 4)            # (kfl, B*P) bf16
    P = OH * OW
    assert P == w_solo.shape[1] == 256, "solo_attention Linear expects 256 = 16*16 pixels"
    assert higher_feature.shape[2] * higher_feature.shape[3] == P

    # HF conv (1x1) consumed in natural CHW layout: pure reshape view, no HBM round trip
    hf_chw = higher_feature.reshape(B, hfc, P)                            # (B, 768, 256) f32

    # ---- fold conv1x1_1 / conv1x1_2 and the hf-channel-mean into the conv weights ----
    Wlf_mat = w_lf.reshape(CS, kfl)
    Whf_mat = w_hf.reshape(CS, hfc)
    w1v = w1.reshape(-1)
    w2v = w2.reshape(-1)
    s1 = jnp.sum(w1v)
    s2 = jnp.sum(w2v)
    v_lf = jnp.stack([w1v[:CS], w2v[:CS]], axis=0)                        # (2, CS)
    v_hf = jnp.stack([w1v[CS:] + s1 / CS, w2v[CS:] + s2 / CS], axis=0)    # (2, CS) (+mean fold)
    w_lf_fold = v_lf @ Wlf_mat                                            # (2, kfl) f32
    w_hf_fold = v_hf @ Whf_mat                                            # (2, hfc) f32
    c_fold = (v_lf @ b_lf + v_hf @ b_hf
              + jnp.concatenate([b1, b2])).reshape(2, 1)                  # (2, 1)  f32
    # pad to 8 rows (one MXU sublane group); bf16 operands, f32 accumulation in kernel
    w_lf8 = jnp.concatenate([w_lf_fold, jnp.zeros((6, kfl), jnp.float32)], 0).astype(jnp.bfloat16)
    w_hf8 = jnp.concatenate([w_hf_fold, jnp.zeros((6, hfc), jnp.float32)], 0).astype(jnp.bfloat16)

    w_solo_mat = w_solo.T                                                 # (256, E) f32
    b_solo2 = b_solo.reshape(1, E)
    solo3 = solo_feature.reshape(B, 1, E)

    # Images per grid step: amortize per-step overhead, but keep >= 2 grid steps
    # (v7x has 2 TensorCores) and stay well inside the scoped-VMEM limit.
    G = 1
    for cand in (4, 2):
        if B % cand == 0 and B // cand >= 2:
            G = cand
            break
    GP = G * P

    flops = 4 * B * P * (kfl + hfc) + 2 * B * P * E
    transcendentals = B * P + B * E
    bytes_accessed = (2 * lf_pat_t.size + 4 * hf_chw.size
                      + 2 * (w_lf8.size + w_hf8.size)
                      + 4 * (w_solo_mat.size + solo3.size + B * E))

    out3 = pl.pallas_call(
        vsa_kernel,
        out_shape=jax.ShapeDtypeStruct((B, 1, E), solo_feature.dtype),
        grid_spec=pltpu.PrefetchScalarGridSpec(
            num_scalar_prefetch=0,
            grid=(B // G,),                                    # G images per step
            in_specs=[
                pl.BlockSpec((kfl, GP), lambda i: (0, i)),     # LF im2col (bf16), transposed
                pl.BlockSpec((G, hfc, P), lambda i: (i, 0, 0)),  # HF raw CHW (f32)
                pl.BlockSpec((8, kfl), lambda i: (0, 0)),      # resident folded LF weight
                pl.BlockSpec((8, hfc), lambda i: (0, 0)),      # resident folded HF weight
                pl.BlockSpec((2, 1), lambda i: (0, 0)),        # folded bias (main, attn)
                pl.BlockSpec((P, E), lambda i: (0, 0)),        # solo Linear weight (256, E)
                pl.BlockSpec((1, E), lambda i: (0, 0)),        # solo Linear bias
                pl.BlockSpec((G, 1, E), lambda i: (i, 0, 0)),  # solo_feature rows
            ],
            out_specs=pl.BlockSpec((G, 1, E), lambda i: (i, 0, 0)),
        ),
        compiler_params=pltpu.CompilerParams(
            dimension_semantics=("parallel",),
            vmem_limit_bytes=32 * 1024 * 1024,
        ),
        cost_estimate=pl.CostEstimate(
            flops=int(flops),
            transcendentals=int(transcendentals),
            bytes_accessed=int(bytes_accessed)),
    )(lf_pat_t, hf_chw, w_lf8, w_hf8, c_fold, w_solo_mat, b_solo2, solo3)

    return out3.reshape(B, E)


# ----------------------------- reference & init -----------------------------

def _torch_default_init(key, fan_in, shape_w, shape_b, dtype=jnp.float32):
    """Mimic torch Conv2d/Linear default init: U(-1/sqrt(fan_in), 1/sqrt(fan_in))."""
    kw, kb = jax.random.split(key)
    bound = 1.0 / math.sqrt(fan_in)
    w = jax.random.uniform(kw, shape_w, dtype, minval=-bound, maxval=bound)
    b = jax.random.uniform(kb, shape_b, dtype, minval=-bound, maxval=bound)
    return w, b


def vsa_reference(lower_feature, higher_feature, solo_feature, params):
    (w_lf, b_lf, w_hf, b_hf, w1, b1, w2, b2, w_solo, b_solo) = params
    dn = ('NCHW', 'OIHW', 'NCHW')
    hp = lax.Precision.HIGHEST
    lf = lax.conv_general_dilated(lower_feature, w_lf, (4, 4), 'VALID',
                                  dimension_numbers=dn, precision=hp) + b_lf[None, :, None, None]
    hf = lax.conv_general_dilated(higher_feature, w_hf, (1, 1), 'VALID',
                                  dimension_numbers=dn, precision=hp) + b_hf[None, :, None, None]
    concat = jnp.concatenate([lf, hf], axis=1)
    concat = jnp.mean(hf, axis=1, keepdims=True) + concat
    main = lax.conv_general_dilated(concat, w1, (1, 1), 'VALID',
                                    dimension_numbers=dn, precision=hp) + b1[None, :, None, None]
    attn = jax.nn.sigmoid(
        lax.conv_general_dilated(concat, w2, (1, 1), 'VALID',
                                 dimension_numbers=dn, precision=hp) + b2[None, :, None, None])
    B = lower_feature.shape[0]
    atted = (main * attn).reshape(B, -1)
    solo_att = jax.nn.sigmoid(jnp.dot(atted, w_solo.T, precision=hp) + b_solo)
    y = solo_feature * solo_att
    norm = jnp.sqrt(jnp.sum(y * y, axis=-1, keepdims=True)) + 1e-8
    return y / norm


if __name__ == "__main__":
    # Config implied by the module: Linear(in=256) forces out_channels=1 and a
    # 16x16 post-conv grid; LF input 64x64 (k=3, s=4 -> 16), HF input 16x16.
    B = 2
    CS = 16       # opt['multiscale']['multiscale_input_channel']
    OUT_CH = 1    # opt['multiscale']['multiscale_output_channel'] (must be 1)
    E = 128       # opt['embed']['embed_dim'] (lane-dense choice)

    key = jax.random.PRNGKey(0)
    k = jax.random.split(key, 8)

    lower_feature = jax.random.normal(k[0], (B, 192, 64, 64), jnp.float32)
    higher_feature = jax.random.normal(k[1], (B, 768, 16, 16), jnp.float32)
    solo_feature = jax.random.normal(k[2], (B, E), jnp.float32)

    w_lf, b_lf = _torch_default_init(k[3], 192 * 9, (CS, 192, 3, 3), (CS,))
    w_hf, b_hf = _torch_default_init(k[4], 768, (CS, 768, 1, 1), (CS,))
    w1, b1 = _torch_default_init(k[5], 2 * CS, (OUT_CH, 2 * CS, 1, 1), (OUT_CH,))
    w2, b2 = _torch_default_init(k[6], 2 * CS, (OUT_CH, 2 * CS, 1, 1), (OUT_CH,))
    w_solo, b_solo = _torch_default_init(k[7], 256, (E, 256), (E,))
    params = (w_lf, b_lf, w_hf, b_hf, w1, b1, w2, b2, w_solo, b_solo)

    out = jax.jit(vsa_pallas)(lower_feature, higher_feature, solo_feature, params)
    out = jax.block_until_ready(out)

    ref = vsa_reference(lower_feature, higher_feature, solo_feature, params)
    assert out.shape == (B, E)
    max_err = float(jnp.max(jnp.abs(out - ref)))
    # bf16 MXU operands (f32 accumulation) vs f32 reference -> relaxed tolerance
    assert jnp.allclose(out, ref, atol=1e-2, rtol=1e-2), f"mismatch vs reference (max abs err {max_err})"

    print("KERNEL_OK")
</pallas_src>

<mosaic_0001>
module attributes {stable_mosaic.version = 11 : i64} {
  func.func @vsa_kernel(%arg0: i32, %arg1: memref<1728x256xbf16, #tpu.memory_space<vmem>>, %arg2: memref<1x768x256xf32, #tpu.memory_space<vmem>>, %arg3: memref<8x1728xbf16, #tpu.memory_space<vmem>>, %arg4: memref<8x768xbf16, #tpu.memory_space<vmem>>, %arg5: memref<2x1xf32, #tpu.memory_space<vmem>>, %arg6: memref<256x128xf32, #tpu.memory_space<vmem>>, %arg7: memref<1x128xf32, #tpu.memory_space<vmem>>, %arg8: memref<1x1x128xf32, #tpu.memory_space<vmem>>, %arg9: memref<1x1x128xf32, #tpu.memory_space<vmem>>) attributes {dimension_semantics = [#tpu.dimension_semantics<parallel>], iteration_bounds = array<i64: 2>, scalar_prefetch = 0 : i64, scratch_operands = 0 : i64, tpu.core_type = #tpu.core_type<tc>, window_params = [{transform_indices = @transform_0, window_bounds = array<i64: 1728, 256>}, {transform_indices = @transform_1, window_bounds = array<i64: 1, 768, 256>}, {pipeline_mode = #tpu.pipeline_mode<synchronous>, transform_indices = @transform_2, window_bounds = array<i64: 8, 1728>}, {pipeline_mode = #tpu.pipeline_mode<synchronous>, transform_indices = @transform_3, window_bounds = array<i64: 8, 768>}, {pipeline_mode = #tpu.pipeline_mode<synchronous>, transform_indices = @transform_4, window_bounds = array<i64: 2, 1>}, {pipeline_mode = #tpu.pipeline_mode<synchronous>, transform_indices = @transform_5, window_bounds = array<i64: 256, 128>}, {pipeline_mode = #tpu.pipeline_mode<synchronous>, transform_indices = @transform_6, window_bounds = array<i64: 1, 128>}, {transform_indices = @transform_7, window_bounds = array<i64: 1, 1, 128>}, {transform_indices = @transform_8, window_bounds = array<i64: 1, 1, 128>}]} {
    %c0 = arith.constant 0 : index
    %c0_0 = arith.constant 0 : index
    %0 = vector.load %arg3[%c0, %c0_0] : memref<8x1728xbf16, #tpu.memory_space<vmem>>, vector<8x1728xbf16>
    %c0_1 = arith.constant 0 : index
    %c0_2 = arith.constant 0 : index
    %1 = vector.load %arg1[%c0_1, %c0_2] : memref<1728x256xbf16, #tpu.memory_space<vmem>>, vector<1728x256xbf16>
    %cst = arith.constant dense<0.000000e+00> : vector<8x256xf32>
    %2 = tpu.matmul %0, %1, %cst {dimension_numbers = #tpu.dot_dimension_numbers<[1], [0], [0], [1], [0, 0, 1, 1], [], []>} : vector<8x1728xbf16>, vector<1728x256xbf16>, vector<8x256xf32> -> vector<8x256xf32>
    %c0_3 = arith.constant 0 : index
    %c0_4 = arith.constant 0 : index
    %c0_5 = arith.constant 0 : index
    %3 = vector.load %arg2[%c0_3, %c0_4, %c0_5] : memref<1x768x256xf32, #tpu.memory_space<vmem>>, vector<1x768x256xf32>
    %4 = vector.shape_cast %3 : vector<1x768x256xf32> to vector<768x256xf32>
    %5 = arith.truncf %4 : vector<768x256xf32> to vector<768x256xbf16>
    %c0_6 = arith.constant 0 : index
    %c0_7 = arith.constant 0 : index
    %6 = vector.load %arg4[%c0_6, %c0_7] : memref<8x768xbf16, #tpu.memory_space<vmem>>, vector<8x768xbf16>
    %cst_8 = arith.constant dense<0.000000e+00> : vector<8x256xf32>
    %7 = tpu.matmul %6, %5, %cst_8 {dimension_numbers = #tpu.dot_dimension_numbers<[1], [0], [0], [1], [0, 0, 1, 1], [], []>} : vector<8x768xbf16>, vector<768x256xbf16>, vector<8x256xf32> -> vector<8x256xf32>
    %8 = arith.addf %2, %7 : vector<8x256xf32>
    %9 = vector.extract_strided_slice %8 {offsets = [0, 0], sizes = [1, 256], strides = [1, 1]} : vector<8x256xf32> to vector<1x256xf32>
    %c0_9 = arith.constant 0 : index
    %c0_10 = arith.constant 0 : index
    %10 = vector.load %arg5[%c0_9, %c0_10] : memref<2x1xf32, #tpu.memory_space<vmem>>, vector<1x1xf32>
    %11 = vector.broadcast %10 : vector<1x1xf32> to vector<1x256xf32>
    %12 = arith.addf %9, %11 : vector<1x256xf32>
    %13 = vector.extract_strided_slice %8 {offsets = [1, 0], sizes = [1, 256], strides = [1, 1]} : vector<8x256xf32> to vector<1x256xf32>
    %c1 = arith.constant 1 : index
    %c0_11 = arith.constant 0 : index
    %14 = vector.load %arg5[%c1, %c0_11] : memref<2x1xf32, #tpu.memory_space<vmem>>, vector<1x1xf32>
    %15 = vector.broadcast %14 : vector<1x1xf32> to vector<1x256xf32>
    %16 = arith.addf %13, %15 : vector<1x256xf32>
    %cst_12 = arith.constant 0.000000e+00 : f32
    %17 = vector.broadcast %cst_12 : f32 to vector<1x256xf32>
    %18 = arith.subf %17, %16 : vector<1x256xf32>
    %19 = math.exp %18 : vector<1x256xf32>
    %cst_13 = arith.constant 1.000000e+00 : f32
    %20 = vector.broadcast %cst_13 : f32 to vector<1x256xf32>
    %21 = arith.addf %20, %19 : vector<1x256xf32>
    %cst_14 = arith.constant 1.000000e+00 : f32
    %22 = vector.broadcast %cst_14 : f32 to vector<1x256xf32>
    %23 = arith.divf %22, %21 : vector<1x256xf32>
    %24 = arith.mulf %12, %23 : vector<1x256xf32>
    %cst_15 = arith.constant 0.000000e+00 : f32
    %25 = vector.broadcast %cst_15 : f32 to vector<7x256xf32>
    %26 = tpu.concatenate %24, %25 in 0 : vector<1x256xf32>, vector<7x256xf32> -> vector<8x256xf32>
    %c0_16 = arith.constant 0 : index
    %c0_17 = arith.constant 0 : index
    %27 = vector.load %arg6[%c0_16, %c0_17] : memref<256x128xf32, #tpu.memory_space<vmem>>, vector<256x128xf32>
    %cst_18 = arith.constant dense<0.000000e+00> : vector<8x128xf32>
    %28 = tpu.matmul %26, %27, %cst_18 {dimension_numbers = #tpu.dot_dimension_numbers<[1], [0], [0], [1], [0, 0, 1, 1], [], []>} : vector<8x256xf32>, vector<256x128xf32>, vector<8x128xf32> -> vector<8x128xf32>
    %c0_19 = arith.constant 0 : index
    %c0_20 = arith.constant 0 : index
    %29 = vector.load %arg7[%c0_19, %c0_20] : memref<1x128xf32, #tpu.memory_space<vmem>>, vector<1x128xf32>
    %30 = vector.broadcast %29 : vector<1x128xf32> to vector<8x128xf32>
    %31 = arith.addf %28, %30 : vector<8x128xf32>
    %cst_21 = arith.constant 0.000000e+00 : f32
    %32 = vector.broadcast %cst_21 : f32 to vector<8x128xf32>
    %33 = arith.subf %32, %31 : vector<8x128xf32>
    %34 = math.exp %33 : vector<8x128xf32>
    %cst_22 = arith.constant 1.000000e+00 : f32
    %35 = vector.broadcast %cst_22 : f32 to vector<8x128xf32>
    %36 = arith.addf %35, %34 : vector<8x128xf32>
    %cst_23 = arith.constant 1.000000e+00 : f32
    %37 = vector.broadcast %cst_23 : f32 to vector<8x128xf32>
    %38 = arith.divf %37, %36 : vector<8x128xf32>
    %c0_24 = arith.constant 0 : index
    %c0_25 = arith.constant 0 : index
    %c0_26 = arith.constant 0 : index
    %39 = vector.load %arg8[%c0_24, %c0_25, %c0_26] : memref<1x1x128xf32, #tpu.memory_space<vmem>>, vector<1x1x128xf32>
    %40 = vector.shape_cast %39 : vector<1x1x128xf32> to vector<1x128xf32>
    %41 = vector.extract_strided_slice %38 {offsets = [0, 0], sizes = [1, 128], strides = [1, 1]} : vector<8x128xf32> to vector<1x128xf32>
    %42 = arith.mulf %40, %41 : vector<1x128xf32>
    %43 = arith.mulf %42, %42 : vector<1x128xf32>
    %cst_27 = arith.constant dense<0.000000e+00> : vector<1xf32>
    %44 = vector.multi_reduction <add>, %43, %cst_27 [1] : vector<1x128xf32> to vector<1xf32>
    %45 = vector.shape_cast %44 : vector<1xf32> to vector<1x1xf32>
    %46 = math.sqrt %45 : vector<1x1xf32>
    %cst_28 = arith.constant 9.99999993E-9 : f32
    %47 = vector.broadcast %cst_28 : f32 to vector<1x1xf32>
    %48 = arith.addf %46, %47 : vector<1x1xf32>
    %49 = vector.broadcast %48 : vector<1x1xf32> to vector<1x128xf32>
    %50 = arith.divf %42, %49 : vector<1x128xf32>
    %c0_29 = arith.constant 0 : index
    %c0_30 = arith.constant 0 : index
    %c0_31 = arith.constant 0 : index
    %51 = vector.load %arg9[%c0_29, %c0_30, %c0_31] : memref<1x1x128xf32, #tpu.memory_space<vmem>>, vector<1x1x128xf32>
    %52 = vector.shape_cast %51 : vector<1x1x128xf32> to vector<1x128xf32>
    %53 = vector.shape_cast %50 : vector<1x128xf32> to vector<1x1x128xf32>
    tpu.vector_store %arg9[%c0_29, %c0_30, %c0_31], %53 {strides = array<i32>} : memref<1x1x128xf32, #tpu.memory_space<vmem>>, vector<1x1x128xf32>,
    return
  }
  func.func @transform_0(%arg0: i32) -> (i32, i32) {
    %c0_i32 = arith.constant 0 : i32
    %c0_i32_0 = arith.constant 0 : i32
    return %c0_i32, %arg0 : i32, i32
  }
  func.func @transform_1(%arg0: i32) -> (i32, i32, i32) {
    %c0_i32 = arith.constant 0 : i32
    %c0_i32_0 = arith.constant 0 : i32
    %c0_i32_1 = arith.constant 0 : i32
    return %arg0, %c0_i32, %c0_i32_0 : i32, i32, i32
  }
  func.func @transform_2(%arg0: i32) -> (i32, i32) {
    %c0_i32 = arith.constant 0 : i32
    %c0_i32_0 = arith.constant 0 : i32
    %c0_i32_1 = arith.constant 0 : i32
    return %c0_i32, %c0_i32_0 : i32, i32
  }
  func.func @transform_3(%arg0: i32) -> (i32, i32) {
    %c0_i32 = arith.constant 0 : i32
    %c0_i32_0 = arith.constant 0 : i32
    %c0_i32_1 = arith.constant 0 : i32
    return %c0_i32, %c0_i32_0 : i32, i32
  }
  func.func @transform_4(%arg0: i32) -> (i32, i32) {
    %c0_i32 = arith.constant 0 : i32
    %c0_i32_0 = arith.constant 0 : i32
    %c0_i32_1 = arith.constant 0 : i32
    return %c0_i32, %c0_i32_0 : i32, i32
  }
  func.func @transform_5(%arg0: i32) -> (i32, i32) {
    %c0_i32 = arith.constant 0 : i32
    %c0_i32_0 = arith.constant 0 : i32
    %c0_i32_1 = arith.constant 0 : i32
    return %c0_i32, %c0_i32_0 : i32, i32
  }
  func.func @transform_6(%arg0: i32) -> (i32, i32) {
    %c0_i32 = arith.constant 0 : i32
    %c0_i32_0 = arith.constant 0 : i32
    %c0_i32_1 = arith.constant 0 : i32
    return %c0_i32, %c0_i32_0 : i32, i32
  }
  func.func @transform_7(%arg0: i32) -> (i32, i32, i32) {
    %c0_i32 = arith.constant 0 : i32
    %c0_i32_0 = arith.constant 0 : i32
    %c0_i32_1 = arith.constant 0 : i32
    return %arg0, %c0_i32, %c0_i32_0 : i32, i32, i32
  }
  func.func @transform_8(%arg0: i32) -> (i32, i32, i32) {
    %c0_i32 = arith.constant 0 : i32
    %c0_i32_0 = arith.constant 0 : i32
    %c0_i32_1 = arith.constant 0 : i32
    return %arg0, %c0_i32, %c0_i32_0 : i32, i32, i32
  }
}

</mosaic_0001>

<bundles_post_ra>
// kernel: vsa_pallas.1
= control target key start
LH: loop header
LB: loop body
LE: loop exit
PB: predicated region body
PF: predicated region fallthrough
CT: control target
= control target key end

     0   :  { %13 = vsyncpa [#allocation4], 0  ;;  %s5611_s0 = inlined_call_operand.vmem [shape: bf16[1728,512], index: 0, kind: input, shape index: {}]   ;;  %s5612_s1 = inlined_call_operand.vmem [shape: f32[2,768,256], index: 1, kind: input, shape index: {}]   ;;  %s5613_s2 = inlined_call_operand.vmem [shape: bf16[8,1728], index: 2, kind: input, shape index: {}]   ;;  %s5614_s3 = inlined_call_operand.vmem [shape: bf16[8,768], index: 3, kind: input, shape index: {}]   ;;  %s5615_s4 = inlined_call_operand.vmem [shape: f32[2,1], index: 4, kind: input, shape index: {}]   ;;  %s5616_s5 = inlined_call_operand.vmem [shape: f32[256,128], index: 5, kind: input, shape index: {}]   ;;  %s5617_s6 = inlined_call_operand.vmem [shape: f32[1,128], index: 6, kind: input, shape index: {}]   ;;  %s5618_s7 = inlined_call_operand.vmem [shape: f32[2,1,128], index: 7, kind: input, shape index: {}]   ;;  %s5619_s8 = inlined_call_operand.hbm [shape: f32[2,1,128], index: 8, kind: output, shape index: {}]  }
   0x1   :  { %15 = vsyncpa [#allocation4 + $0x1], 0  ;;  %s4443_s27 = smov 0   ;;  %s4445_s28 = smov 0  }
   0x2   :  { %s4447_s29 = smov 0   ;;  %s4449_s30 = smov 0  }
   0x3 LB: > { %s4464_s9 = sadd.s32 4294967295, %s4394_s30   ;;  %s3578_s10 = sadd.s32 4294967294, %s4394_s30   ;;  %s4394_s30 = sphi %s4449_s30, %s5625_s30   ;;  %s4390_s29 = sphi %s4447_s29, %s5624_s29   ;;  %s4386_s28 = sphi %s4445_s28, %s5623_s28   ;;  %s4382_s27 = sphi %s4443_s27, %s5622_s27  }
   0x4   : > { %s4468_s11 = sadd.s32 1, %s4394_s30   ;;  %s28_s12 = sadd.s32 1, %s4390_s29 }
   0x5   : > { %s25_s13 = ssub.s32 %s4394_s30, %s4468_s11  ;;  %p35_p0 = scmp.ne.s32.totalorder %s4390_s29, %s4386_s28 }
   0x6   : > { %p26_p1 = scmp.eq.s32.totalorder %s25_s13, 0  ;;  %p36_p2 = scmp.eq.s32.totalorder %s4394_s30, 0 }
   0x7   : > { %p222_p3 = scmp.eq.s32.totalorder %s4464_s9, 1  ;;  %p227_p4 = scmp.ne.s32.totalorder %s4386_s28, %s4382_s27 }
   0x8   : > { %s4480_s14 = scalar_select %p26_p1, %s4390_s29, %s28_s12  }
   0x9   : > { %p37_p5 = por %p36_p2, %p35_p0  ;;  %p4482_p6 = por %p222_p3, %p35_p0 }
   0xa   : > { %p228_p7 = scmp.eq.s32.totalorder %s3578_s10, 1  ;;  %p3580_p9 = scmp.ge.s32.totalorder %s4394_s30, 2 }
   0xc   : > { %p4486_p8 = por %p228_p7, %p227_p4  ;;  %259 = sbr.rel (%p3580_p9) target bundleno = 131 (0x83), region = 36 }
  0x13   : > { %262 = sbr.rel (!%p37_p5) target bundleno = 131 (0x83), region = 40  ;;  %s264_s17 = sand.u32 (%p37_p5), 1, %s4390_s29  }
  0x14   : > { %s3828_s18 = sshll.u32 (%p37_p5), %s4394_s30, 3  ;;  %s3928_s19 = smul.u32 (%p37_p5), 1728, %s264_s17 }
  0x15   : > { %s4498_s22 = scalar_lea.vmem (%p37_p5), %s5611_s0, %s3828_s18 }
  0x16   : > { %v727_v0 = vld [vmem:[%s4498_s22] sm:$0xff] (%p37_p5)  ;;  %v729_v1 = vld [vmem:[%s4498_s22 + $0x10] sm:$0xff] (%p37_p5)  ;;  %s4506_s23 = scalar_lea.vmem (%p37_p5), [#allocation2], %s3928_s19 }
  0x17   : > { %v731_v2 = vld [vmem:[%s4498_s22 + $0x20] sm:$0xff] (%p37_p5)  ;;  %v733_v3 = vld [vmem:[%s4498_s22 + $0x30] sm:$0xff] (%p37_p5)  ;;  %728 = vst [vmem:[%s4506_s23] sm:$0xff] (%p37_p5), %v727_v0  ;;  %730 = vst [vmem:[%s4506_s23 + $0x8] sm:$0xff] (%p37_p5), %v729_v1 }
  0x18   : > { %v735_v4 = vld [vmem:[%s4498_s22 + $0x40] sm:$0xff] (%p37_p5)  ;;  %v737_v5 = vld [vmem:[%s4498_s22 + $0x50] sm:$0xff] (%p37_p5)  ;;  %732 = vst [vmem:[%s4506_s23 + $0x10] sm:$0xff] (%p37_p5), %v731_v2  ;;  %734 = vst [vmem:[%s4506_s23 + $0x18] sm:$0xff] (%p37_p5), %v733_v3 }
  0x19   : > { %736 = vst [vmem:[%s4506_s23 + $0x20] sm:$0xff] (%p37_p5), %v735_v4  ;;  %738 = vst [vmem:[%s4506_s23 + $0x28] sm:$0xff] (%p37_p5), %v737_v5  ;;  %v739_v6 = vld [vmem:[%s4498_s22 + $0x60] sm:$0xff] (%p37_p5)  ;;  %v741_v7 = vld [vmem:[%s4498_s22 + $0x70] sm:$0xff] (%p37_p5) }
  0x1a   : > { %v743_v8 = vld [vmem:[%s4498_s22 + $0x80] sm:$0xff]  ;;  %740 = vst [vmem:[%s4506_s23 + $0x30] sm:$0xff] %v739_v6  ;;  %742 = vst [vmem:[%s4506_s23 + $0x38] sm:$0xff] %v741_v7  ;;  %v745_v9 = vld [vmem:[%s4498_s22 + $0x90] sm:$0xff] }
  0x1b   : > { %744 = vst [vmem:[%s4506_s23 + $0x40] sm:$0xff] %v743_v8  ;;  %v747_v10 = vld [vmem:[%s4498_s22 + $0xa0] sm:$0xff]  ;;  %v749_v11 = vld [vmem:[%s4498_s22 + $0xb0] sm:$0xff]  ;;  %746 = vst [vmem:[%s4506_s23 + $0x48] sm:$0xff] %v745_v9 }
  0x1c   : > { %748 = vst [vmem:[%s4506_s23 + $0x50] sm:$0xff] %v747_v10  ;;  %750 = vst [vmem:[%s4506_s23 + $0x58] sm:$0xff] %v749_v11  ;;  %v751_v12 = vld [vmem:[%s4498_s22 + $0xc0] sm:$0xff]  ;;  %v753_v13 = vld [vmem:[%s4498_s22 + $0xd0] sm:$0xff] }
  0x1d   : > { %v755_v14 = vld [vmem:[%s4498_s22 + $0xe0] sm:$0xff]  ;;  %752 = vst [vmem:[%s4506_s23 + $0x60] sm:$0xff] %v751_v12  ;;  %754 = vst [vmem:[%s4506_s23 + $0x68] sm:$0xff] %v753_v13  ;;  %v757_v15 = vld [vmem:[%s4498_s22 + $0xf0] sm:$0xff] }
  0x1e   : > { %756 = vst [vmem:[%s4506_s23 + $0x70] sm:$0xff] %v755_v14  ;;  %v759_v16 = vld [vmem:[%s4498_s22 + $0x100] sm:$0xff]  ;;  %v761_v17 = vld [vmem:[%s4498_s22 + $0x110] sm:$0xff]  ;;  %758 = vst [vmem:[%s4506_s23 + $0x78] sm:$0xff] %v757_v15 }
  0x1f   : > { %760 = vst [vmem:[%s4506_s23 + $0x80] sm:$0xff] %v759_v16  ;;  %762 = vst [vmem:[%s4506_s23 + $0x88] sm:$0xff] %v761_v17  ;;  %v763_v18 = vld [vmem:[%s4498_s22 + $0x120] sm:$0xff]  ;;  %v765_v19 = vld [vmem:[%s4498_s22 + $0x130] sm:$0xff] }
  0x20   : > { %v767_v20 = vld [vmem:[%s4498_s22 + $0x140] sm:$0xff]  ;;  %764 = vst [vmem:[%s4506_s23 + $0x90] sm:$0xff] %v763_v18  ;;  %766 = vst [vmem:[%s4506_s23 + $0x98] sm:$0xff] %v765_v19  ;;  %v769_v21 = vld [vmem:[%s4498_s22 + $0x150] sm:$0xff] }
  0x21   : > { %768 = vst [vmem:[%s4506_s23 + $0xa0] sm:$0xff] %v767_v20  ;;  %v771_v22 = vld [vmem:[%s4498_s22 + $0x160] sm:$0xff]  ;;  %v773_v23 = vld [vmem:[%s4498_s22 + $0x170] sm:$0xff]  ;;  %770 = vst [vmem:[%s4506_s23 + $0xa8] sm:$0xff] %v769_v21 }
  0x22   : > { %772 = vst [vmem:[%s4506_s23 + $0xb0] sm:$0xff] %v771_v22  ;;  %774 = vst [vmem:[%s4506_s23 + $0xb8] sm:$0xff] %v773_v23  ;;  %v775_v24 = vld [vmem:[%s4498_s22 + $0x180] sm:$0xff]  ;;  %v777_v25 = vld [vmem:[%s4498_s22 + $0x190] sm:$0xff] }
  0x23   : > { %v779_v26 = vld [vmem:[%s4498_s22 + $0x1a0] sm:$0xff]  ;;  %776 = vst [vmem:[%s4506_s23 + $0xc0] sm:$0xff] %v775_v24  ;;  %778 = vst [vmem:[%s4506_s23 + $0xc8] sm:$0xff] %v777_v25  ;;  %v781_v27 = vld [vmem:[%s4498_s22 + $0x1b0] sm:$0xff] }
  0x24   : > { %780 = vst [vmem:[%s4506_s23 + $0xd0] sm:$0xff] %v779_v26  ;;  %v783_v28 = vld [vmem:[%s4498_s22 + $0x1c0] sm:$0xff]  ;;  %v785_v29 = vld [vmem:[%s4498_s22 + $0x1d0] sm:$0xff]  ;;  %782 = vst [vmem:[%s4506_s23 + $0xd8] sm:$0xff] %v781_v27 }
  0x25   : > { %784 = vst [vmem:[%s4506_s23 + $0xe0] sm:$0xff] %v783_v28  ;;  %786 = vst [vmem:[%s4506_s23 + $0xe8] sm:$0xff] %v785_v29  ;;  %v787_v30 = vld [vmem:[%s4498_s22 + $0x1e0] sm:$0xff]  ;;  %v789_v31 = vld [vmem:[%s4498_s22 + $0x1f0] sm:$0xff] }
  0x26   : > { %v791_v32 = vld [vmem:[%s4498_s22 + $0x200] sm:$0xff]  ;;  %788 = vst [vmem:[%s4506_s23 + $0xf0] sm:$0xff] %v787_v30  ;;  %790 = vst [vmem:[%s4506_s23 + $0xf8] sm:$0xff] %v789_v31  ;;  %v793_v33 = vld [vmem:[%s4498_s22 + $0x210] sm:$0xff] }
  0x27   : > { %792 = vst [vmem:[%s4506_s23 + $0x100] sm:$0xff] %v791_v32  ;;  %v795_v34 = vld [vmem:[%s4498_s22 + $0x220] sm:$0xff]  ;;  %v797_v35 = vld [vmem:[%s4498_s22 + $0x230] sm:$0xff]  ;;  %794 = vst [vmem:[%s4506_s23 + $0x108] sm:$0xff] %v793_v33 }
  0x28   : > { %796 = vst [vmem:[%s4506_s23 + $0x110] sm:$0xff] %v795_v34  ;;  %798 = vst [vmem:[%s4506_s23 + $0x118] sm:$0xff] %v797_v35  ;;  %v799_v36 = vld [vmem:[%s4498_s22 + $0x240] sm:$0xff]  ;;  %v801_v37 = vld [vmem:[%s4498_s22 + $0x250] sm:$0xff] }
  0x29   : > { %v803_v38 = vld [vmem:[%s4498_s22 + $0x260] sm:$0xff]  ;;  %800 = vst [vmem:[%s4506_s23 + $0x120] sm:$0xff] %v799_v36  ;;  %802 = vst [vmem:[%s4506_s23 + $0x128] sm:$0xff] %v801_v37  ;;  %v805_v39 = vld [vmem:[%s4498_s22 + $0x270] sm:$0xff] }
  0x2a   : > { %804 = vst [vmem:[%s4506_s23 + $0x130] sm:$0xff] %v803_v38  ;;  %v807_v40 = vld [vmem:[%s4498_s22 + $0x280] sm:$0xff]  ;;  %v809_v41 = vld [vmem:[%s4498_s22 + $0x290] sm:$0xff]  ;;  %806 = vst [vmem:[%s4506_s23 + $0x138] sm:$0xff] %v805_v39 }
  0x2b   : > { %808 = vst [vmem:[%s4506_s23 + $0x140] sm:$0xff] %v807_v40  ;;  %810 = vst [vmem:[%s4506_s23 + $0x148] sm:$0xff] %v809_v41  ;;  %v811_v42 = vld [vmem:[%s4498_s22 + $0x2a0] sm:$0xff]  ;;  %v813_v43 = vld [vmem:[%s4498_s22 + $0x2b0] sm:$0xff] }
  0x2c   : > { %v815_v44 = vld [vmem:[%s4498_s22 + $0x2c0] sm:$0xff]  ;;  %812 = vst [vmem:[%s4506_s23 + $0x150] sm:$0xff] %v811_v42  ;;  %814 = vst [vmem:[%s4506_s23 + $0x158] sm:$0xff] %v813_v43  ;;  %v817_v45 = vld [vmem:[%s4498_s22 + $0x2d0] sm:$0xff] }
  0x2d   : > { %816 = vst [vmem:[%s4506_s23 + $0x160] sm:$0xff] %v815_v44  ;;  %v819_v46 = vld [vmem:[%s4498_s22 + $0x2e0] sm:$0xff]  ;;  %v821_v47 = vld [vmem:[%s4498_s22 + $0x2f0] sm:$0xff]  ;;  %818 = vst [vmem:[%s4506_s23 + $0x168] sm:$0xff] %v817_v45 }
  0x2e   : > { %820 = vst [vmem:[%s4506_s23 + $0x170] sm:$0xff] %v819_v46  ;;  %822 = vst [vmem:[%s4506_s23 + $0x178] sm:$0xff] %v821_v47  ;;  %v823_v48 = vld [vmem:[%s4498_s22 + $0x300] sm:$0xff]  ;;  %v825_v49 = vld [vmem:[%s4498_s22 + $0x310] sm:$0xff] }
  0x2f   : > { %v827_v50 = vld [vmem:[%s4498_s22 + $0x320] sm:$0xff]  ;;  %824 = vst [vmem:[%s4506_s23 + $0x180] sm:$0xff] %v823_v48  ;;  %826 = vst [vmem:[%s4506_s23 + $0x188] sm:$0xff] %v825_v49  ;;  %v829_v51 = vld [vmem:[%s4498_s22 + $0x330] sm:$0xff] }
  0x30   : > { %828 = vst [vmem:[%s4506_s23 + $0x190] sm:$0xff] %v827_v50  ;;  %v831_v52 = vld [vmem:[%s4498_s22 + $0x340] sm:$0xff]  ;;  %v833_v53 = vld [vmem:[%s4498_s22 + $0x350] sm:$0xff]  ;;  %830 = vst [vmem:[%s4506_s23 + $0x198] sm:$0xff] %v829_v51 }
  0x31   : > { %832 = vst [vmem:[%s4506_s23 + $0x1a0] sm:$0xff] %v831_v52  ;;  %834 = vst [vmem:[%s4506_s23 + $0x1a8] sm:$0xff] %v833_v53  ;;  %v835_v54 = vld [vmem:[%s4498_s22 + $0x360] sm:$0xff]  ;;  %v837_v55 = vld [vmem:[%s4498_s22 + $0x370] sm:$0xff] }
  0x32   : > { %v839_v56 = vld [vmem:[%s4498_s22 + $0x380] sm:$0xff]  ;;  %836 = vst [vmem:[%s4506_s23 + $0x1b0] sm:$0xff] %v835_v54  ;;  %838 = vst [vmem:[%s4506_s23 + $0x1b8] sm:$0xff] %v837_v55  ;;  %v841_v57 = vld [vmem:[%s4498_s22 + $0x390] sm:$0xff] }
  0x33   : > { %840 = vst [vmem:[%s4506_s23 + $0x1c0] sm:$0xff] %v839_v56  ;;  %v843_v58 = vld [vmem:[%s4498_s22 + $0x3a0] sm:$0xff]  ;;  %v845_v59 = vld [vmem:[%s4498_s22 + $0x3b0] sm:$0xff]  ;;  %842 = vst [vmem:[%s4506_s23 + $0x1c8] sm:$0xff] %v841_v57 }
  0x34   : > { %844 = vst [vmem:[%s4506_s23 + $0x1d0] sm:$0xff] %v843_v58  ;;  %846 = vst [vmem:[%s4506_s23 + $0x1d8] sm:$0xff] %v845_v59  ;;  %v847_v60 = vld [vmem:[%s4498_s22 + $0x3c0] sm:$0xff]  ;;  %v849_v61 = vld [vmem:[%s4498_s22 + $0x3d0] sm:$0xff] }
  0x35   : > { %v851_v62 = vld [vmem:[%s4498_s22 + $0x3e0] sm:$0xff]  ;;  %848 = vst [vmem:[%s4506_s23 + $0x1e0] sm:$0xff] %v847_v60  ;;  %850 = vst [vmem:[%s4506_s23 + $0x1e8] sm:$0xff] %v849_v61  ;;  %v853_v63 = vld [vmem:[%s4498_s22 + $0x3f0] sm:$0xff] }
  0x36   : > { %852 = vst [vmem:[%s4506_s23 + $0x1f0] sm:$0xff] %v851_v62  ;;  %v855_v0 = vld [vmem:[%s4498_s22 + $0x400] sm:$0xff]  ;;  %v857_v1 = vld [vmem:[%s4498_s22 + $0x410] sm:$0xff]  ;;  %854 = vst [vmem:[%s4506_s23 + $0x1f8] sm:$0xff] %v853_v63 }
  0x37   : > { %856 = vst [vmem:[%s4506_s23 + $0x200] sm:$0xff] %v855_v0  ;;  %858 = vst [vmem:[%s4506_s23 + $0x208] sm:$0xff] %v857_v1  ;;  %v859_v2 = vld [vmem:[%s4498_s22 + $0x420] sm:$0xff]  ;;  %v861_v3 = vld [vmem:[%s4498_s22 + $0x430] sm:$0xff] }
  0x38   : > { %v863_v4 = vld [vmem:[%s4498_s22 + $0x440] sm:$0xff]  ;;  %860 = vst [vmem:[%s4506_s23 + $0x210] sm:$0xff] %v859_v2  ;;  %862 = vst [vmem:[%s4506_s23 + $0x218] sm:$0xff] %v861_v3  ;;  %v865_v5 = vld [vmem:[%s4498_s22 + $0x450] sm:$0xff] }
  0x39   : > { %864 = vst [vmem:[%s4506_s23 + $0x220] sm:$0xff] %v863_v4  ;;  %v867_v6 = vld [vmem:[%s4498_s22 + $0x460] sm:$0xff]  ;;  %v869_v7 = vld [vmem:[%s4498_s22 + $0x470] sm:$0xff]  ;;  %866 = vst [vmem:[%s4506_s23 + $0x228] sm:$0xff] %v865_v5 }
  0x3a   : > { %868 = vst [vmem:[%s4506_s23 + $0x230] sm:$0xff] %v867_v6  ;;  %870 = vst [vmem:[%s4506_s23 + $0x238] sm:$0xff] %v869_v7  ;;  %v871_v8 = vld [vmem:[%s4498_s22 + $0x480] sm:$0xff]  ;;  %v873_v9 = vld [vmem:[%s4498_s22 + $0x490] sm:$0xff] }
  0x3b   : > { %v875_v10 = vld [vmem:[%s4498_s22 + $0x4a0] sm:$0xff]  ;;  %872 = vst [vmem:[%s4506_s23 + $0x240] sm:$0xff] %v871_v8  ;;  %874 = vst [vmem:[%s4506_s23 + $0x248] sm:$0xff] %v873_v9  ;;  %v877_v11 = vld [vmem:[%s4498_s22 + $0x4b0] sm:$0xff] }
  0x3c   : > { %876 = vst [vmem:[%s4506_s23 + $0x250] sm:$0xff] %v875_v10  ;;  %v879_v12 = vld [vmem:[%s4498_s22 + $0x4c0] sm:$0xff]  ;;  %v881_v13 = vld [vmem:[%s4498_s22 + $0x4d0] sm:$0xff]  ;;  %878 = vst [vmem:[%s4506_s23 + $0x258] sm:$0xff] %v877_v11 }
  0x3d   : > { %880 = vst [vmem:[%s4506_s23 + $0x260] sm:$0xff] %v879_v12  ;;  %882 = vst [vmem:[%s4506_s23 + $0x268] sm:$0xff] %v881_v13  ;;  %v883_v14 = vld [vmem:[%s4498_s22 + $0x4e0] sm:$0xff]  ;;  %v885_v15 = vld [vmem:[%s4498_s22 + $0x4f0] sm:$0xff] }
  0x3e   : > { %v887_v16 = vld [vmem:[%s4498_s22 + $0x500] sm:$0xff]  ;;  %884 = vst [vmem:[%s4506_s23 + $0x270] sm:$0xff] %v883_v14  ;;  %886 = vst [vmem:[%s4506_s23 + $0x278] sm:$0xff] %v885_v15  ;;  %v889_v17 = vld [vmem:[%s4498_s22 + $0x510] sm:$0xff] }
  0x3f   : > { %888 = vst [vmem:[%s4506_s23 + $0x280] sm:$0xff] %v887_v16  ;;  %v891_v18 = vld [vmem:[%s4498_s22 + $0x520] sm:$0xff]  ;;  %v893_v19 = vld [vmem:[%s4498_s22 + $0x530] sm:$0xff]  ;;  %890 = vst [vmem:[%s4506_s23 + $0x288] sm:$0xff] %v889_v17 }
  0x40   : > { %892 = vst [vmem:[%s4506_s23 + $0x290] sm:$0xff] %v891_v18  ;;  %894 = vst [vmem:[%s4506_s23 + $0x298] sm:$0xff] %v893_v19  ;;  %v895_v20 = vld [vmem:[%s4498_s22 + $0x540] sm:$0xff]  ;;  %v897_v21 = vld [vmem:[%s4498_s22 + $0x550] sm:$0xff] }
  0x41   : > { %v899_v22 = vld [vmem:[%s4498_s22 + $0x560] sm:$0xff]  ;;  %896 = vst [vmem:[%s4506_s23 + $0x2a0] sm:$0xff] %v895_v20  ;;  %898 = vst [vmem:[%s4506_s23 + $0x2a8] sm:$0xff] %v897_v21  ;;  %v901_v23 = vld [vmem:[%s4498_s22 + $0x570] sm:$0xff] }
  0x42   : > { %900 = vst [vmem:[%s4506_s23 + $0x2b0] sm:$0xff] %v899_v22  ;;  %v903_v24 = vld [vmem:[%s4498_s22 + $0x580] sm:$0xff]  ;;  %v905_v25 = vld [vmem:[%s4498_s22 + $0x590] sm:$0xff]  ;;  %902 = vst [vmem:[%s4506_s23 + $0x2b8] sm:$0xff] %v901_v23 }
  0x43   : > { %904 = vst [vmem:[%s4506_s23 + $0x2c0] sm:$0xff] %v903_v24  ;;  %906 = vst [vmem:[%s4506_s23 + $0x2c8] sm:$0xff] %v905_v25  ;;  %v907_v26 = vld [vmem:[%s4498_s22 + $0x5a0] sm:$0xff]  ;;  %v909_v27 = vld [vmem:[%s4498_s22 + $0x5b0] sm:$0xff] }
  0x44   : > { %v911_v28 = vld [vmem:[%s4498_s22 + $0x5c0] sm:$0xff]  ;;  %908 = vst [vmem:[%s4506_s23 + $0x2d0] sm:$0xff] %v907_v26  ;;  %910 = vst [vmem:[%s4506_s23 + $0x2d8] sm:$0xff] %v909_v27  ;;  %v913_v29 = vld [vmem:[%s4498_s22 + $0x5d0] sm:$0xff] }
  0x45   : > { %912 = vst [vmem:[%s4506_s23 + $0x2e0] sm:$0xff] %v911_v28  ;;  %v915_v30 = vld [vmem:[%s4498_s22 + $0x5e0] sm:$0xff]  ;;  %v917_v31 = vld [vmem:[%s4498_s22 + $0x5f0] sm:$0xff]  ;;  %914 = vst [vmem:[%s4506_s23 + $0x2e8] sm:$0xff] %v913_v29 }
  0x46   : > { %916 = vst [vmem:[%s4506_s23 + $0x2f0] sm:$0xff] %v915_v30  ;;  %918 = vst [vmem:[%s4506_s23 + $0x2f8] sm:$0xff] %v917_v31  ;;  %v919_v32 = vld [vmem:[%s4498_s22 + $0x600] sm:$0xff]  ;;  %v921_v33 = vld [vmem:[%s4498_s22 + $0x610] sm:$0xff] }
  0x47   : > { %v923_v34 = vld [vmem:[%s4498_s22 + $0x620] sm:$0xff]  ;;  %920 = vst [vmem:[%s4506_s23 + $0x300] sm:$0xff] %v919_v32  ;;  %922 = vst [vmem:[%s4506_s23 + $0x308] sm:$0xff] %v921_v33  ;;  %v925_v35 = vld [vmem:[%s4498_s22 + $0x630] sm:$0xff] }
  0x48   : > { %924 = vst [vmem:[%s4506_s23 + $0x310] sm:$0xff] %v923_v34  ;;  %v927_v36 = vld [vmem:[%s4498_s22 + $0x640] sm:$0xff]  ;;  %v929_v37 = vld [vmem:[%s4498_s22 + $0x650] sm:$0xff]  ;;  %926 = vst [vmem:[%s4506_s23 + $0x318] sm:$0xff] %v925_v35 }
  0x49   : > { %928 = vst [vmem:[%s4506_s23 + $0x320] sm:$0xff] %v927_v36  ;;  %930 = vst [vmem:[%s4506_s23 + $0x328] sm:$0xff] %v929_v37  ;;  %v931_v38 = vld [vmem:[%s4498_s22 + $0x660] sm:$0xff]  ;;  %v933_v39 = vld [vmem:[%s4498_s22 + $0x670] sm:$0xff] }
  0x4a   : > { %v935_v40 = vld [vmem:[%s4498_s22 + $0x680] sm:$0xff]  ;;  %932 = vst [vmem:[%s4506_s23 + $0x330] sm:$0xff] %v931_v38  ;;  %934 = vst [vmem:[%s4506_s23 + $0x338] sm:$0xff] %v933_v39  ;;  %v937_v41 = vld [vmem:[%s4498_s22 + $0x690] sm:$0xff] }
  0x4b   : > { %936 = vst [vmem:[%s4506_s23 + $0x340] sm:$0xff] %v935_v40  ;;  %v939_v42 = vld [vmem:[%s4498_s22 + $0x6a0] sm:$0xff]  ;;  %v941_v43 = vld [vmem:[%s4498_s22 + $0x6b0] sm:$0xff]  ;;  %938 = vst [vmem:[%s4506_s23 + $0x348] sm:$0xff] %v937_v41 }
  0x4c   : > { %940 = vst [vmem:[%s4506_s23 + $0x350] sm:$0xff] %v939_v42  ;;  %942 = vst [vmem:[%s4506_s23 + $0x358] sm:$0xff] %v941_v43  ;;  %v943_v44 = vld [vmem:[%s4498_s22 + $0x6c0] sm:$0xff]  ;;  %v945_v45 = vld [vmem:[%s4498_s22 + $0x6d0] sm:$0xff] }
  0x4d   : > { %v947_v46 = vld [vmem:[%s4498_s22 + $0x6e0] sm:$0xff]  ;;  %944 = vst [vmem:[%s4506_s23 + $0x360] sm:$0xff] %v943_v44  ;;  %946 = vst [vmem:[%s4506_s23 + $0x368] sm:$0xff] %v945_v45  ;;  %v949_v47 = vld [vmem:[%s4498_s22 + $0x6f0] sm:$0xff] }
  0x4e   : > { %948 = vst [vmem:[%s4506_s23 + $0x370] sm:$0xff] %v947_v46  ;;  %v951_v48 = vld [vmem:[%s4498_s22 + $0x700] sm:$0xff]  ;;  %v953_v49 = vld [vmem:[%s4498_s22 + $0x710] sm:$0xff]  ;;  %950 = vst [vmem:[%s4506_s23 + $0x378] sm:$0xff] %v949_v47 }
  0x4f   : > { %952 = vst [vmem:[%s4506_s23 + $0x380] sm:$0xff] %v951_v48  ;;  %954 = vst [vmem:[%s4506_s23 + $0x388] sm:$0xff] %v953_v49  ;;  %v955_v50 = vld [vmem:[%s4498_s22 + $0x720] sm:$0xff]  ;;  %v957_v51 = vld [vmem:[%s4498_s22 + $0x730] sm:$0xff] }
  0x50   : > { %v959_v52 = vld [vmem:[%s4498_s22 + $0x740] sm:$0xff]  ;;  %956 = vst [vmem:[%s4506_s23 + $0x390] sm:$0xff] %v955_v50  ;;  %958 = vst [vmem:[%s4506_s23 + $0x398] sm:$0xff] %v957_v51  ;;  %v961_v53 = vld [vmem:[%s4498_s22 + $0x750] sm:$0xff] }
  0x51   : > { %960 = vst [vmem:[%s4506_s23 + $0x3a0] sm:$0xff] %v959_v52  ;;  %v963_v54 = vld [vmem:[%s4498_s22 + $0x760] sm:$0xff]  ;;  %v965_v55 = vld [vmem:[%s4498_s22 + $0x770] sm:$0xff]  ;;  %962 = vst [vmem:[%s4506_s23 + $0x3a8] sm:$0xff] %v961_v53 }
  0x52   : > { %964 = vst [vmem:[%s4506_s23 + $0x3b0] sm:$0xff] %v963_v54  ;;  %966 = vst [vmem:[%s4506_s23 + $0x3b8] sm:$0xff] %v965_v55  ;;  %v967_v56 = vld [vmem:[%s4498_s22 + $0x780] sm:$0xff]  ;;  %v969_v57 = vld [vmem:[%s4498_s22 + $0x790] sm:$0xff] }
  0x53   : > { %v971_v58 = vld [vmem:[%s4498_s22 + $0x7a0] sm:$0xff]  ;;  %968 = vst [vmem:[%s4506_s23 + $0x3c0] sm:$0xff] %v967_v56  ;;  %970 = vst [vmem:[%s4506_s23 + $0x3c8] sm:$0xff] %v969_v57  ;;  %v973_v59 = vld [vmem:[%s4498_s22 + $0x7b0] sm:$0xff] }
  0x54   : > { %972 = vst [vmem:[%s4506_s23 + $0x3d0] sm:$0xff] %v971_v58  ;;  %v975_v60 = vld [vmem:[%s4498_s22 + $0x7c0] sm:$0xff]  ;;  %v977_v61 = vld [vmem:[%s4498_s22 + $0x7d0] sm:$0xff]  ;;  %974 = vst [vmem:[%s4506_s23 + $0x3d8] sm:$0xff] %v973_v59 }
  0x55   : > { %976 = vst [vmem:[%s4506_s23 + $0x3e0] sm:$0xff] %v975_v60  ;;  %978 = vst [vmem:[%s4506_s23 + $0x3e8] sm:$0xff] %v977_v61  ;;  %v979_v62 = vld [vmem:[%s4498_s22 + $0x7e0] sm:$0xff]  ;;  %v981_v63 = vld [vmem:[%s4498_s22 + $0x7f0] sm:$0xff] }
  0x56   : > { %v983_v0 = vld [vmem:[%s4498_s22 + $0x800] sm:$0xff]  ;;  %980 = vst [vmem:[%s4506_s23 + $0x3f0] sm:$0xff] %v979_v62  ;;  %982 = vst [vmem:[%s4506_s23 + $0x3f8] sm:$0xff] %v981_v63  ;;  %v985_v1 = vld [vmem:[%s4498_s22 + $0x810] sm:$0xff] }
  0x57   : > { %984 = vst [vmem:[%s4506_s23 + $0x400] sm:$0xff] %v983_v0  ;;  %v987_v2 = vld [vmem:[%s4498_s22 + $0x820] sm:$0xff]  ;;  %v989_v3 = vld [vmem:[%s4498_s22 + $0x830] sm:$0xff]  ;;  %986 = vst [vmem:[%s4506_s23 + $0x408] sm:$0xff] %v985_v1 }
  0x58   : > { %988 = vst [vmem:[%s4506_s23 + $0x410] sm:$0xff] %v987_v2  ;;  %990 = vst [vmem:[%s4506_s23 + $0x418] sm:$0xff] %v989_v3  ;;  %v991_v4 = vld [vmem:[%s4498_s22 + $0x840] sm:$0xff]  ;;  %v993_v5 = vld [vmem:[%s4498_s22 + $0x850] sm:$0xff] }
  0x59   : > { %v995_v6 = vld [vmem:[%s4498_s22 + $0x860] sm:$0xff]  ;;  %992 = vst [vmem:[%s4506_s23 + $0x420] sm:$0xff] %v991_v4  ;;  %994 = vst [vmem:[%s4506_s23 + $0x428] sm:$0xff] %v993_v5  ;;  %v997_v7 = vld [vmem:[%s4498_s22 + $0x870] sm:$0xff] }
  0x5a   : > { %996 = vst [vmem:[%s4506_s23 + $0x430] sm:$0xff] %v995_v6  ;;  %v999_v8 = vld [vmem:[%s4498_s22 + $0x880] sm:$0xff]  ;;  %v1001_v9 = vld [vmem:[%s4498_s22 + $0x890] sm:$0xff]  ;;  %998 = vst [vmem:[%s4506_s23 + $0x438] sm:$0xff] %v997_v7 }
  0x5b   : > { %1000 = vst [vmem:[%s4506_s23 + $0x440] sm:$0xff] %v999_v8  ;;  %1002 = vst [vmem:[%s4506_s23 + $0x448] sm:$0xff] %v1001_v9  ;;  %v1003_v10 = vld [vmem:[%s4498_s22 + $0x8a0] sm:$0xff]  ;;  %v1005_v11 = vld [vmem:[%s4498_s22 + $0x8b0] sm:$0xff] }
  0x5c   : > { %v1007_v12 = vld [vmem:[%s4498_s22 + $0x8c0] sm:$0xff]  ;;  %1004 = vst [vmem:[%s4506_s23 + $0x450] sm:$0xff] %v1003_v10  ;;  %1006 = vst [vmem:[%s4506_s23 + $0x458] sm:$0xff] %v1005_v11  ;;  %v1009_v13 = vld [vmem:[%s4498_s22 + $0x8d0] sm:$0xff] }
  0x5d   : > { %1008 = vst [vmem:[%s4506_s23 + $0x460] sm:$0xff] %v1007_v12  ;;  %v1011_v14 = vld [vmem:[%s4498_s22 + $0x8e0] sm:$0xff]  ;;  %v1013_v15 = vld [vmem:[%s4498_s22 + $0x8f0] sm:$0xff]  ;;  %1010 = vst [vmem:[%s4506_s23 + $0x468] sm:$0xff] %v1009_v13 }
  0x5e   : > { %1012 = vst [vmem:[%s4506_s23 + $0x470] sm:$0xff] %v1011_v14  ;;  %1014 = vst [vmem:[%s4506_s23 + $0x478] sm:$0xff] %v1013_v15  ;;  %v1015_v16 = vld [vmem:[%s4498_s22 + $0x900] sm:$0xff]  ;;  %v1017_v17 = vld [vmem:[%s4498_s22 + $0x910] sm:$0xff] }
  0x5f   : > { %v1019_v18 = vld [vmem:[%s4498_s22 + $0x920] sm:$0xff]  ;;  %1016 = vst [vmem:[%s4506_s23 + $0x480] sm:$0xff] %v1015_v16  ;;  %1018 = vst [vmem:[%s4506_s23 + $0x488] sm:$0xff] %v1017_v17  ;;  %v1021_v19 = vld [vmem:[%s4498_s22 + $0x930] sm:$0xff] }
  0x60   : > { %1020 = vst [vmem:[%s4506_s23 + $0x490] sm:$0xff] %v1019_v18  ;;  %v1023_v20 = vld [vmem:[%s4498_s22 + $0x940] sm:$0xff]  ;;  %v1025_v21 = vld [vmem:[%s4498_s22 + $0x950] sm:$0xff]  ;;  %1022 = vst [vmem:[%s4506_s23 + $0x498] sm:$0xff] %v1021_v19 }
  0x61   : > { %1024 = vst [vmem:[%s4506_s23 + $0x4a0] sm:$0xff] %v1023_v20  ;;  %1026 = vst [vmem:[%s4506_s23 + $0x4a8] sm:$0xff] %v1025_v21  ;;  %v1027_v22 = vld [vmem:[%s4498_s22 + $0x960] sm:$0xff]  ;;  %v1029_v23 = vld [vmem:[%s4498_s22 + $0x970] sm:$0xff] }
  0x62   : > { %v1031_v24 = vld [vmem:[%s4498_s22 + $0x980] sm:$0xff]  ;;  %1028 = vst [vmem:[%s4506_s23 + $0x4b0] sm:$0xff] %v1027_v22  ;;  %1030 = vst [vmem:[%s4506_s23 + $0x4b8] sm:$0xff] %v1029_v23  ;;  %v1033_v25 = vld [vmem:[%s4498_s22 + $0x990] sm:$0xff] }
  0x63   : > { %1032 = vst [vmem:[%s4506_s23 + $0x4c0] sm:$0xff] %v1031_v24  ;;  %v1035_v26 = vld [vmem:[%s4498_s22 + $0x9a0] sm:$0xff]  ;;  %v1037_v27 = vld [vmem:[%s4498_s22 + $0x9b0] sm:$0xff]  ;;  %1034 = vst [vmem:[%s4506_s23 + $0x4c8] sm:$0xff] %v1033_v25 }
  0x64   : > { %1036 = vst [vmem:[%s4506_s23 + $0x4d0] sm:$0xff] %v1035_v26  ;;  %1038 = vst [vmem:[%s4506_s23 + $0x4d8] sm:$0xff] %v1037_v27  ;;  %v1039_v28 = vld [vmem:[%s4498_s22 + $0x9c0] sm:$0xff]  ;;  %v1041_v29 = vld [vmem:[%s4498_s22 + $0x9d0] sm:$0xff] }
  0x65   : > { %v1043_v30 = vld [vmem:[%s4498_s22 + $0x9e0] sm:$0xff]  ;;  %1040 = vst [vmem:[%s4506_s23 + $0x4e0] sm:$0xff] %v1039_v28  ;;  %1042 = vst [vmem:[%s4506_s23 + $0x4e8] sm:$0xff] %v1041_v29  ;;  %v1045_v31 = vld [vmem:[%s4498_s22 + $0x9f0] sm:$0xff] }
  0x66   : > { %1044 = vst [vmem:[%s4506_s23 + $0x4f0] sm:$0xff] %v1043_v30  ;;  %v1047_v32 = vld [vmem:[%s4498_s22 + $0xa00] sm:$0xff]  ;;  %v1049_v33 = vld [vmem:[%s4498_s22 + $0xa10] sm:$0xff]  ;;  %1046 = vst [vmem:[%s4506_s23 + $0x4f8] sm:$0xff] %v1045_v31 }
  0x67   : > { %1048 = vst [vmem:[%s4506_s23 + $0x500] sm:$0xff] %v1047_v32  ;;  %1050 = vst [vmem:[%s4506_s23 + $0x508] sm:$0xff] %v1049_v33  ;;  %v1051_v34 = vld [vmem:[%s4498_s22 + $0xa20] sm:$0xff]  ;;  %v1053_v35 = vld [vmem:[%s4498_s22 + $0xa30] sm:$0xff] }
  0x68   : > { %v1055_v36 = vld [vmem:[%s4498_s22 + $0xa40] sm:$0xff]  ;;  %1052 = vst [vmem:[%s4506_s23 + $0x510] sm:$0xff] %v1051_v34  ;;  %1054 = vst [vmem:[%s4506_s23 + $0x518] sm:$0xff] %v1053_v35  ;;  %v1057_v37 = vld [vmem:[%s4498_s22 + $0xa50] sm:$0xff] }
  0x69   : > { %1056 = vst [vmem:[%s4506_s23 + $0x520] sm:$0xff] %v1055_v36  ;;  %v1059_v38 = vld [vmem:[%s4498_s22 + $0xa60] sm:$0xff]  ;;  %v1061_v39 = vld [vmem:[%s4498_s22 + $0xa70] sm:$0xff]  ;;  %1058 = vst [vmem:[%s4506_s23 + $0x528] sm:$0xff] %v1057_v37 }
  0x6a   : > { %1060 = vst [vmem:[%s4506_s23 + $0x530] sm:$0xff] %v1059_v38  ;;  %1062 = vst [vmem:[%s4506_s23 + $0x538] sm:$0xff] %v1061_v39  ;;  %v1063_v40 = vld [vmem:[%s4498_s22 + $0xa80] sm:$0xff]  ;;  %v1065_v41 = vld [vmem:[%s4498_s22 + $0xa90] sm:$0xff] }
  0x6b   : > { %v1067_v42 = vld [vmem:[%s4498_s22 + $0xaa0] sm:$0xff]  ;;  %1064 = vst [vmem:[%s4506_s23 + $0x540] sm:$0xff] %v1063_v40  ;;  %1066 = vst [vmem:[%s4506_s23 + $0x548] sm:$0xff] %v1065_v41  ;;  %v1069_v43 = vld [vmem:[%s4498_s22 + $0xab0] sm:$0xff] }
  0x6c   : > { %1068 = vst [vmem:[%s4506_s23 + $0x550] sm:$0xff] %v1067_v42  ;;  %v1071_v44 = vld [vmem:[%s4498_s22 + $0xac0] sm:$0xff]  ;;  %v1073_v45 = vld [vmem:[%s4498_s22 + $0xad0] sm:$0xff]  ;;  %1070 = vst [vmem:[%s4506_s23 + $0x558] sm:$0xff] %v1069_v43 }
  0x6d   : > { %1072 = vst [vmem:[%s4506_s23 + $0x560] sm:$0xff] %v1071_v44  ;;  %1074 = vst [vmem:[%s4506_s23 + $0x568] sm:$0xff] %v1073_v45  ;;  %v1075_v46 = vld [vmem:[%s4498_s22 + $0xae0] sm:$0xff]  ;;  %v1077_v47 = vld [vmem:[%s4498_s22 + $0xaf0] sm:$0xff] }
  0x6e   : > { %v1079_v48 = vld [vmem:[%s4498_s22 + $0xb00] sm:$0xff]  ;;  %1076 = vst [vmem:[%s4506_s23 + $0x570] sm:$0xff] %v1075_v46  ;;  %1078 = vst [vmem:[%s4506_s23 + $0x578] sm:$0xff] %v1077_v47  ;;  %v1081_v49 = vld [vmem:[%s4498_s22 + $0xb10] sm:$0xff] }
  0x6f   : > { %1080 = vst [vmem:[%s4506_s23 + $0x580] sm:$0xff] %v1079_v48  ;;  %v1083_v50 = vld [vmem:[%s4498_s22 + $0xb20] sm:$0xff]  ;;  %v1085_v51 = vld [vmem:[%s4498_s22 + $0xb30] sm:$0xff]  ;;  %1082 = vst [vmem:[%s4506_s23 + $0x588] sm:$0xff] %v1081_v49 }
  0x70   : > { %1084 = vst [vmem:[%s4506_s23 + $0x590] sm:$0xff] %v1083_v50  ;;  %1086 = vst [vmem:[%s4506_s23 + $0x598] sm:$0xff] %v1085_v51  ;;  %v1087_v52 = vld [vmem:[%s4498_s22 + $0xb40] sm:$0xff]  ;;  %v1089_v53 = vld [vmem:[%s4498_s22 + $0xb50] sm:$0xff] }
  0x71   : > { %v1091_v54 = vld [vmem:[%s4498_s22 + $0xb60] sm:$0xff]  ;;  %1088 = vst [vmem:[%s4506_s23 + $0x5a0] sm:$0xff] %v1087_v52  ;;  %1090 = vst [vmem:[%s4506_s23 + $0x5a8] sm:$0xff] %v1089_v53  ;;  %v1093_v55 = vld [vmem:[%s4498_s22 + $0xb70] sm:$0xff] }
  0x72   : > { %1092 = vst [vmem:[%s4506_s23 + $0x5b0] sm:$0xff] %v1091_v54  ;;  %v1095_v56 = vld [vmem:[%s4498_s22 + $0xb80] sm:$0xff]  ;;  %v1097_v57 = vld [vmem:[%s4498_s22 + $0xb90] sm:$0xff]  ;;  %1094 = vst [vmem:[%s4506_s23 + $0x5b8] sm:$0xff] %v1093_v55 }
  0x73   : > { %1096 = vst [vmem:[%s4506_s23 + $0x5c0] sm:$0xff] %v1095_v56  ;;  %1098 = vst [vmem:[%s4506_s23 + $0x5c8] sm:$0xff] %v1097_v57  ;;  %v1099_v58 = vld [vmem:[%s4498_s22 + $0xba0] sm:$0xff]  ;;  %v1101_v59 = vld [vmem:[%s4498_s22 + $0xbb0] sm:$0xff] }
  0x74   : > { %v1103_v60 = vld [vmem:[%s4498_s22 + $0xbc0] sm:$0xff]  ;;  %1100 = vst [vmem:[%s4506_s23 + $0x5d0] sm:$0xff] %v1099_v58  ;;  %1102 = vst [vmem:[%s4506_s23 + $0x5d8] sm:$0xff] %v1101_v59  ;;  %v1105_v61 = vld [vmem:[%s4498_s22 + $0xbd0] sm:$0xff] }
  0x75   : > { %1104 = vst [vmem:[%s4506_s23 + $0x5e0] sm:$0xff] %v1103_v60  ;;  %v1107_v62 = vld [vmem:[%s4498_s22 + $0xbe0] sm:$0xff]  ;;  %v1109_v63 = vld [vmem:[%s4498_s22 + $0xbf0] sm:$0xff]  ;;  %1106 = vst [vmem:[%s4506_s23 + $0x5e8] sm:$0xff] %v1105_v61 }
  0x76   : > { %1108 = vst [vmem:[%s4506_s23 + $0x5f0] sm:$0xff] %v1107_v62  ;;  %1110 = vst [vmem:[%s4506_s23 + $0x5f8] sm:$0xff] %v1109_v63  ;;  %v1111_v0 = vld [vmem:[%s4498_s22 + $0xc00] sm:$0xff]  ;;  %v1113_v1 = vld [vmem:[%s4498_s22 + $0xc10] sm:$0xff] }
  0x77   : > { %v1115_v2 = vld [vmem:[%s4498_s22 + $0xc20] sm:$0xff]  ;;  %1112 = vst [vmem:[%s4506_s23 + $0x600] sm:$0xff] %v1111_v0  ;;  %1114 = vst [vmem:[%s4506_s23 + $0x608] sm:$0xff] %v1113_v1  ;;  %v1117_v3 = vld [vmem:[%s4498_s22 + $0xc30] sm:$0xff] }
  0x78   : > { %1116 = vst [vmem:[%s4506_s23 + $0x610] sm:$0xff] %v1115_v2  ;;  %v1119_v4 = vld [vmem:[%s4498_s22 + $0xc40] sm:$0xff]  ;;  %v1121_v5 = vld [vmem:[%s4498_s22 + $0xc50] sm:$0xff]  ;;  %1118 = vst [vmem:[%s4506_s23 + $0x618] sm:$0xff] %v1117_v3 }
  0x79   : > { %1120 = vst [vmem:[%s4506_s23 + $0x620] sm:$0xff] %v1119_v4  ;;  %1122 = vst [vmem:[%s4506_s23 + $0x628] sm:$0xff] %v1121_v5  ;;  %v1123_v6 = vld [vmem:[%s4498_s22 + $0xc60] sm:$0xff]  ;;  %v1125_v7 = vld [vmem:[%s4498_s22 + $0xc70] sm:$0xff] }
  0x7a   : > { %v1127_v8 = vld [vmem:[%s4498_s22 + $0xc80] sm:$0xff]  ;;  %1124 = vst [vmem:[%s4506_s23 + $0x630] sm:$0xff] %v1123_v6  ;;  %1126 = vst [vmem:[%s4506_s23 + $0x638] sm:$0xff] %v1125_v7  ;;  %v1129_v9 = vld [vmem:[%s4498_s22 + $0xc90] sm:$0xff] }
  0x7b   : > { %1128 = vst [vmem:[%s4506_s23 + $0x640] sm:$0xff] %v1127_v8  ;;  %v1131_v10 = vld [vmem:[%s4498_s22 + $0xca0] sm:$0xff]  ;;  %v1133_v11 = vld [vmem:[%s4498_s22 + $0xcb0] sm:$0xff]  ;;  %1130 = vst [vmem:[%s4506_s23 + $0x648] sm:$0xff] %v1129_v9 }
  0x7c   : > { %1132 = vst [vmem:[%s4506_s23 + $0x650] sm:$0xff] %v1131_v10  ;;  %1134 = vst [vmem:[%s4506_s23 + $0x658] sm:$0xff] %v1133_v11  ;;  %v1135_v12 = vld [vmem:[%s4498_s22 + $0xcc0] sm:$0xff]  ;;  %v1137_v13 = vld [vmem:[%s4498_s22 + $0xcd0] sm:$0xff] }
  0x7d   : > { %v1139_v14 = vld [vmem:[%s4498_s22 + $0xce0] sm:$0xff]  ;;  %1136 = vst [vmem:[%s4506_s23 + $0x660] sm:$0xff] %v1135_v12  ;;  %1138 = vst [vmem:[%s4506_s23 + $0x668] sm:$0xff] %v1137_v13  ;;  %v1141_v15 = vld [vmem:[%s4498_s22 + $0xcf0] sm:$0xff] }
  0x7e   : > { %1140 = vst [vmem:[%s4506_s23 + $0x670] sm:$0xff] %v1139_v14  ;;  %v1143_v16 = vld [vmem:[%s4498_s22 + $0xd00] sm:$0xff]  ;;  %v1145_v17 = vld [vmem:[%s4498_s22 + $0xd10] sm:$0xff]  ;;  %1142 = vst [vmem:[%s4506_s23 + $0x678] sm:$0xff] %v1141_v15 }
  0x7f   : > { %1144 = vst [vmem:[%s4506_s23 + $0x680] sm:$0xff] %v1143_v16  ;;  %1146 = vst [vmem:[%s4506_s23 + $0x688] sm:$0xff] %v1145_v17  ;;  %v1147_v18 = vld [vmem:[%s4498_s22 + $0xd20] sm:$0xff]  ;;  %v1149_v19 = vld [vmem:[%s4498_s22 + $0xd30] sm:$0xff] }
  0x80   : > { %v1151_v20 = vld [vmem:[%s4498_s22 + $0xd40] sm:$0xff]  ;;  %1148 = vst [vmem:[%s4506_s23 + $0x690] sm:$0xff] %v1147_v18  ;;  %1150 = vst [vmem:[%s4506_s23 + $0x698] sm:$0xff] %v1149_v19  ;;  %v1153_v21 = vld [vmem:[%s4498_s22 + $0xd50] sm:$0xff] }
  0x81   : > { %1152 = vst [vmem:[%s4506_s23 + $0x6a0] sm:$0xff] %v1151_v20  ;;  %v1155_v22 = vld [vmem:[%s4498_s22 + $0xd60] sm:$0xff]  ;;  %v1157_v23 = vld [vmem:[%s4498_s22 + $0xd70] sm:$0xff]  ;;  %1154 = vst [vmem:[%s4506_s23 + $0x6a8] sm:$0xff] %v1153_v21 }
  0x82   : > { %1156 = vst [vmem:[%s4506_s23 + $0x6b0] sm:$0xff] %v1155_v22  ;;  %1158 = vst [vmem:[%s4506_s23 + $0x6b8] sm:$0xff] %v1157_v23 }
  0x83 PF: > { %p3583_p10 = scmp.ge.s32.totalorder %s4394_s30, 1  ;;  %p1177_p11 = scmp.lt.s32.totalorder %s4394_s30, 3 }
  0x85   : > { %p1178_p12 = pnand %p3583_p10, %p1177_p11 }
  0x86   : > { %s4937_s24 = sand.u32 (!%p1178_p12), 1, %s4386_s28   ;;  %p1225_p13 = scmp.lt.s32.totalorder (!%p1178_p12), %s4464_s9, 1  ;;  %v4943_v24 = vld [vmem:[%s5613_s2 + $0x8] sm:$0xff] (!%p1178_p12)  ;;  %v4948_v25 = vld [vmem:[%s5614_s3] sm:$0xff] (!%p1178_p12)  ;;  %vm3020_vm0 = vcmask (!%p1178_p12), 523264   ;;  %vm3348_vm1 = vcmask (!%p1178_p12), 1040384  }
  0x87   : > { %1181 = sbr.rel (%p1178_p12) target bundleno = 1148 (0x47c), region = 86  ;;  %v3594_v26 = vcombine.high (!%p1178_p12), %v4943_v24, %v4943_v24  ;;  %v3586_v27 = vcombine.high (!%p1178_p12), %v4948_v25, %v4948_v25  ;;  %s1223_s10 = scalar_lea.vmem (!%p1178_p12), [#allocation3], %s4937_s24 }
  0x88   : > { %s3929_s13 = smul.u32 (!%p1178_p12), 1728, %s4937_s24  ;;  %s3496_s12 = sshll.u32 (!%p1178_p12), %s1223_s10, 4  ;;  %s5569_s12 = int_to_ptr.vmem [resolvable:$true] %s3496_s12 }
  0x89   : > { %3097 = vmatprep.mubr.bf16.mxu0 (!%p1178_p12), %v3594_v26  ;;  %1801 = vmatprep.mubr.bf16.mxu1 (!%p1178_p12), %v3586_v27  ;;  %s3484_s20 = scalar_lea.sflag (!%p1178_p12), [#allocation4], %s4937_s24  ;;  %s4332_s21 = scalar_lea.vmem (!%p1178_p12), %s5569_s12, 16 }
  0x8a   : > { %s4958_s18 = scalar_lea.vmem (!%p1178_p12), [#allocation2], %s3929_s13  ;;  %p4333_p0 = scmp.ne.s32.totalorder (!%p1178_p12), %s5569_s12, %s4332_s21 }
  0x8b   : > { %v3972_v28 = vld [vmem:[%s4958_s18 + $0x104] ss:$8 sps:$4 sm:$0xff] (!%p1178_p12)   ;;  %v3974_v29 = vld [vmem:[%s4958_s18 + $0x100] ss:$8 sps:$4 sm:$0xff] (!%p1178_p12)   ;;  %v3975_v30 = vld [vmem:[%s4958_s18 + $0x114] ss:$8 sps:$4 sm:$0xff] (!%p1178_p12)  }
  0x8c   : > { %3065 = vmatprep.subr.bf16.mxu0 (!%p1178_p12), %v3972_v28  ;;  %v3977_v31 = vld [vmem:[%s4958_s18 + $0x110] ss:$8 sps:$4 sm:$0xff] (!%p1178_p12)   ;;  %v3978_v43 = vld [vmem:[%s4958_s18 + $0x124] ss:$8 sps:$4 sm:$0xff] (!%p1178_p12)   ;;  %v3980_v44 = vld [vmem:[%s4958_s18 + $0x120] ss:$8 sps:$4 sm:$0xff] (!%p1178_p12)   ;;  %p4334_p1 = pnand (!%p1178_p12), %p4333_p0, %p4482_p6 }
  0x8d   : > { %3066 = vmatpush1.bf16.msra.mxu0 (!%p1178_p12), %v3974_v29  ;;  %v3981_v51 = vld [vmem:[%s4958_s18 + $0x134] ss:$8 sps:$4 sm:$0xff] (!%p1178_p12)   ;;  %v3983_v55 = vld [vmem:[%s4958_s18 + $0x130] ss:$8 sps:$4 sm:$0xff] (!%p1178_p12)   ;;  %v3984_v59 = vld [vmem:[%s4958_s18 + $0x144] ss:$8 sps:$4 sm:$0xff] (!%p1178_p12)  }
  0x8e   : > { %s4956_s17 = scalar_select %p1225_p13, %s4464_s9, 1  ;;  %3067 = vmatprep.subr.bf16.mxu0 %v3975_v30  ;;  %v3986_v63 = vld [vmem:[%s4958_s18 + $0x140] ss:$8 sps:$4 sm:$0xff]   ;;  %v3987_v3 = vld [vmem:[%s4958_s18 + $0x154] ss:$8 sps:$4 sm:$0xff]  }
  0x8f   : > { %v3989_v7 = vld [vmem:[%s4958_s18 + $0x150] ss:$8 sps:$4 sm:$0xff]   ;;  %v3990_v11 = vld [vmem:[%s4958_s18 + $0x164] ss:$8 sps:$4 sm:$0xff]   ;;  %v3992_v15 = vld [vmem:[%s4958_s18 + $0x160] ss:$8 sps:$4 sm:$0xff]   ;;  %p4335_p2 = pneg %p4334_p1 }
  0x90   : > { %s3930_s19 = smul.u32 1536, %s4956_s17  ;;  %v3993_v19 = vld [vmem:[%s4958_s18 + $0x174] ss:$8 sps:$4 sm:$0xff]   ;;  %v3995_v23 = vld [vmem:[%s4958_s18 + $0x170] ss:$8 sps:$4 sm:$0xff]   ;;  %s1232_s26 = scalar_lea.vmem %s5618_s7, %s4956_s17 }
  0x91   : > { %3068 = vmatpush1.bf16.msra.mxu0 %v3977_v31  ;;  %v3996_v29 = vld [vmem:[%s4958_s18 + $0x184] ss:$8 sps:$4 sm:$0xff]   ;;  %s3825_s17 = sshll.u32 %s4464_s9, 4  ;;  %s4397_s9 = smov [#allocation3]  }
  0x92   : > { %s4966_s22 = scalar_lea.vmem %s5612_s1, %s3930_s19  ;;  %3069 = vmatprep.subr.bf16.mxu0 %v3978_v43  ;;  %s5567_s19 = scalar_lea.hbm %s5619_s8, %s3825_s17 }
  0x93   : > { %v1458_v32 = vld [vmem:[%s4966_s22 + $0x8] sm:$0xff]  ;;  %v1460_v33 = vld [vmem:[%s4966_s22 + $0x18] sm:$0xff]  ;;  %v1457_v34 = vld [vmem:[%s4966_s22] sm:$0xff]  ;;  %s4336_s23 = sshll.u32 %s4397_s9, 4  ;;  %s4337_s23 = int_to_ptr.vmem [resolvable:$false] %s4336_s23 }
  0x94   : > { %v1650_v35 = vpack.c.bf16 %v1460_v33, %v1458_v32  ;;  %v1459_v36 = vld [vmem:[%s4966_s22 + $0x10] sm:$0xff]  ;;  %v1462_v37 = vld [vmem:[%s4966_s22 + $0x28] sm:$0xff]  ;;  %v1464_v38 = vld [vmem:[%s4966_s22 + $0x38] sm:$0xff]  ;;  %p4339_p3 = scmp.lt.s32.totalorder %s5569_s12, %s4337_s23 }
  0x95   : > { %v1649_v39 = vpack.c.bf16 %v1459_v36, %v1457_v34  ;;  %v1652_v40 = vpack.c.bf16 %v1464_v38, %v1462_v37  ;;  %v1461_v41 = vld [vmem:[%s4966_s22 + $0x20] sm:$0xff]  ;;  %v1463_v42 = vld [vmem:[%s4966_s22 + $0x30] sm:$0xff]  ;;  %v1466_v45 = vld [vmem:[%s4966_s22 + $0x48] sm:$0xff]  ;;  %3070 = vmatpush1.bf16.msra.mxu0 %v3980_v44 }
  0x96   : > { %1769 = vmatprep.subr.bf16.mxu1 %v1650_v35  ;;  %v1651_v46 = vpack.c.bf16 %v1463_v42, %v1461_v41  ;;  %v1468_v47 = vld [vmem:[%s4966_s22 + $0x58] sm:$0xff]  ;;  %v1465_v48 = vld [vmem:[%s4966_s22 + $0x40] sm:$0xff]  ;;  %v1467_v49 = vld [vmem:[%s4966_s22 + $0x50] sm:$0xff]  ;;  %3071 = vmatprep.subr.bf16.mxu0 %v3981_v51 }
  0x97   : > { %1770 = vmatpush1.bf16.msra.mxu1 %v1649_v39  ;;  %v1654_v50 = vpack.c.bf16 %v1468_v47, %v1466_v45  ;;  %v1470_v52 = vld [vmem:[%s4966_s22 + $0x68] sm:$0xff]  ;;  %v1472_v53 = vld [vmem:[%s4966_s22 + $0x78] sm:$0xff]  ;;  %v1653_v54 = vpack.c.bf16 %v1467_v49, %v1465_v48  ;;  %v1469_v56 = vld [vmem:[%s4966_s22 + $0x60] sm:$0xff] }
  0x98   : > { %1771 = vmatprep.subr.bf16.mxu1 %v1652_v40  ;;  %v1656_v57 = vpack.c.bf16 %v1472_v53, %v1470_v52  ;;  %v1471_v58 = vld [vmem:[%s4966_s22 + $0x70] sm:$0xff]  ;;  %v1474_v60 = vld [vmem:[%s4966_s22 + $0x88] sm:$0xff]  ;;  %v1476_v61 = vld [vmem:[%s4966_s22 + $0x98] sm:$0xff] }
  0x99   : > { %3072 = vmatpush1.bf16.msra.mxu0 %v3983_v55  ;;  %v1655_v62 = vpack.c.bf16 %v1471_v58, %v1469_v56  ;;  %v1473_v0 = vld [vmem:[%s4966_s22 + $0x80] sm:$0xff]  ;;  %v1475_v1 = vld [vmem:[%s4966_s22 + $0x90] sm:$0xff]  ;;  %v1658_v2 = vpack.c.bf16 %v1476_v61, %v1474_v60  ;;  %v1478_v4 = vld [vmem:[%s4966_s22 + $0xa8] sm:$0xff] }
  0x9a   : > { %3073 = vmatprep.subr.bf16.mxu0 %v3984_v59  ;;  %v1480_v5 = vld [vmem:[%s4966_s22 + $0xb8] sm:$0xff]  ;;  %v1657_v6 = vpack.c.bf16 %v1475_v1, %v1473_v0  ;;  %v1477_v8 = vld [vmem:[%s4966_s22 + $0xa0] sm:$0xff]  ;;  %v1479_v10 = vld [vmem:[%s4966_s22 + $0xb0] sm:$0xff] }
  0x9b   : > { %1772 = vmatpush1.bf16.msra.mxu1 %v1651_v46  ;;  %v1660_v9 = vpack.c.bf16 %v1480_v5, %v1478_v4  ;;  %v1482_v12 = vld [vmem:[%s4966_s22 + $0xc8] sm:$0xff]  ;;  %v1484_v13 = vld [vmem:[%s4966_s22 + $0xd8] sm:$0xff]  ;;  %v1659_v14 = vpack.c.bf16 %v1479_v10, %v1477_v8  ;;  %v1481_v16 = vld [vmem:[%s4966_s22 + $0xc0] sm:$0xff] }
  0x9c   : > { %1773 = vmatprep.subr.bf16.mxu1 %v1654_v50  ;;  %v1483_v17 = vld [vmem:[%s4966_s22 + $0xd0] sm:$0xff]  ;;  %v1662_v18 = vpack.c.bf16 %v1484_v13, %v1482_v12  ;;  %v1486_v20 = vld [vmem:[%s4966_s22 + $0xe8] sm:$0xff]  ;;  %v1488_v21 = vld [vmem:[%s4966_s22 + $0xf8] sm:$0xff] }
  0x9d   : > { %3074 = vmatpush1.bf16.msra.mxu0 %v3986_v63  ;;  %v1661_v22 = vpack.c.bf16 %v1483_v17, %v1481_v16  ;;  %v1485_v26 = vld [vmem:[%s4966_s22 + $0xe0] sm:$0xff]  ;;  %v1664_v27 = vpack.c.bf16 %v1488_v21, %v1486_v20  ;;  %v1487_v28 = vld [vmem:[%s4966_s22 + $0xf0] sm:$0xff]  ;;  %v1490_v30 = vld [vmem:[%s4966_s22 + $0x108] sm:$0xff] }
  0x9e   : > { %3075 = vmatprep.subr.bf16.mxu0 %v3987_v3  ;;  %v1492_v31 = vld [vmem:[%s4966_s22 + $0x118] sm:$0xff]  ;;  %v1663_v32 = vpack.c.bf16 %v1487_v28, %v1485_v26  ;;  %v3998_v33 = vld [vmem:[%s4958_s18 + $0x180] ss:$8 sps:$4 sm:$0xff]   ;;  %v1491_v35 = vld [vmem:[%s4966_s22 + $0x110] sm:$0xff] }
  0x9f   : > { %1774 = vmatpush1.bf16.msra.mxu1 %v1653_v54  ;;  %v1489_v34 = vld [vmem:[%s4966_s22 + $0x100] sm:$0xff]  ;;  %v1666_v36 = vpack.c.bf16 %v1492_v31, %v1490_v30  ;;  %v3999_v37 = vld [vmem:[%s4958_s18 + $0x194] ss:$8 sps:$4 sm:$0xff]   ;;  %v1494_v38 = vld [vmem:[%s4966_s22 + $0x128] sm:$0xff] }
  0xa0   : > { %1775 = vmatprep.subr.bf16.mxu1 %v1656_v57  ;;  %v1496_v39 = vld [vmem:[%s4966_s22 + $0x138] sm:$0xff]  ;;  %v1665_v40 = vpack.c.bf16 %v1491_v35, %v1489_v34  ;;  %v1493_v42 = vld [vmem:[%s4966_s22 + $0x120] sm:$0xff]  ;;  %v1495_v44 = vld [vmem:[%s4966_s22 + $0x130] sm:$0xff]  ;;  %v3593_v34 = vcombine.low %v4943_v24, %v4943_v24 }
  0xa1   : > { %3076 = vmatpush1.bf16.msra.mxu0 %v3989_v7  ;;  %v4001_v41 = vld [vmem:[%s4958_s18 + $0x190] ss:$8 sps:$4 sm:$0xff]   ;;  %v1668_v43 = vpack.c.bf16 %v1496_v39, %v1494_v38  ;;  %v4002_v45 = vld [vmem:[%s4958_s18 + $0x1a4] ss:$8 sps:$4 sm:$0xff]   ;;  %v1667_v48 = vpack.c.bf16 %v1495_v44, %v1493_v42  ;;  %v4004_v49 = vld [vmem:[%s4958_s18 + $0x1a0] ss:$8 sps:$4 sm:$0xff]   ;;  %v3585_v44 = vcombine.low %v4948_v25, %v4948_v25 }
  0xa2   : > { %3077 = vmatprep.subr.bf16.mxu0 %v3990_v11  ;;  %v1498_v46 = vld [vmem:[%s4966_s22 + $0x148] sm:$0xff]  ;;  %v1500_v47 = vld [vmem:[%s4966_s22 + $0x158] sm:$0xff]  ;;  %v1497_v50 = vld [vmem:[%s4966_s22 + $0x140] sm:$0xff] }
  0xa3   : > { %1776 = vmatpush1.bf16.msra.mxu1 %v1655_v62  ;;  %v1499_v51 = vld [vmem:[%s4966_s22 + $0x150] sm:$0xff]  ;;  %v1670_v52 = vpack.c.bf16 %v1500_v47, %v1498_v46  ;;  %v1502_v54 = vld [vmem:[%s4966_s22 + $0x168] sm:$0xff]  ;;  %v1504_v55 = vld [vmem:[%s4966_s22 + $0x178] sm:$0xff] }
  0xa4   : > { %1777 = vmatprep.subr.bf16.mxu1 %v1658_v2  ;;  %v4005_v53 = vld [vmem:[%s4958_s18 + $0x1b4] ss:$8 sps:$4 sm:$0xff]   ;;  %v1669_v56 = vpack.c.bf16 %v1499_v51, %v1497_v50  ;;  %v4007_v57 = vld [vmem:[%s4958_s18 + $0x1b0] ss:$8 sps:$4 sm:$0xff]   ;;  %v1501_v58 = vld [vmem:[%s4966_s22 + $0x160] sm:$0xff]  ;;  %v1672_v59 = vpack.c.bf16 %v1504_v55, %v1502_v54 }
  0xa5   : > { %3078 = vmatpush1.bf16.msra.mxu0 %v3992_v15  ;;  %v1503_v60 = vld [vmem:[%s4966_s22 + $0x170] sm:$0xff]  ;;  %v4008_v61 = vld [vmem:[%s4958_s18 + $0x1c4] ss:$8 sps:$4 sm:$0xff]   ;;  %v1508_v63 = vld [vmem:[%s4966_s22 + $0x198] sm:$0xff] }
  0xa6   : > { %3079 = vmatprep.subr.bf16.mxu0 %v3993_v19  ;;  %v1506_v62 = vld [vmem:[%s4966_s22 + $0x188] sm:$0xff]  ;;  %v1671_v0 = vpack.c.bf16 %v1503_v60, %v1501_v58  ;;  %v1505_v2 = vld [vmem:[%s4966_s22 + $0x180] sm:$0xff]  ;;  %v1507_v3 = vld [vmem:[%s4966_s22 + $0x190] sm:$0xff] }
  0xa7   : > { %1778 = vmatpush1.bf16.msra.mxu1 %v1657_v6  ;;  %v4010_v1 = vld [vmem:[%s4958_s18 + $0x1c0] ss:$8 sps:$4 sm:$0xff]   ;;  %v1674_v4 = vpack.c.bf16 %v1508_v63, %v1506_v62  ;;  %v4011_v5 = vld [vmem:[%s4958_s18 + $0x1d4] ss:$8 sps:$4 sm:$0xff]   ;;  %v1673_v8 = vpack.c.bf16 %v1507_v3, %v1505_v2  ;;  %v4014_v13 = vld [vmem:[%s4958_s18 + $0x1e4] ss:$8 sps:$4 sm:$0xff]  }
  0xa8   : > { %1779 = vmatprep.subr.bf16.mxu1 %v1660_v9  ;;  %v1510_v6 = vld [vmem:[%s4966_s22 + $0x1a8] sm:$0xff]  ;;  %v1512_v7 = vld [vmem:[%s4966_s22 + $0x1b8] sm:$0xff]  ;;  %v1509_v10 = vld [vmem:[%s4966_s22 + $0x1a0] sm:$0xff] }
  0xa9   : > { %3080 = vmatpush1.bf16.msra.mxu0 %v3995_v23  ;;  %v4013_v9 = vld [vmem:[%s4958_s18 + $0x1d0] ss:$8 sps:$4 sm:$0xff]   ;;  %v1676_v11 = vpack.c.bf16 %v1512_v7, %v1510_v6  ;;  %v4016_v17 = vld [vmem:[%s4958_s18 + $0x1e0] ss:$8 sps:$4 sm:$0xff]   ;;  %v4017_v21 = vld [vmem:[%s4958_s18 + $0x1f4] ss:$8 sps:$4 sm:$0xff]  }
  0xaa   : > { %3081 = vmatprep.subr.bf16.mxu0 %v3996_v29  ;;  %v1511_v12 = vld [vmem:[%s4966_s22 + $0x1b0] sm:$0xff]  ;;  %v1516_v15 = vld [vmem:[%s4966_s22 + $0x1d8] sm:$0xff]  ;;  %v1517_v28 = vld [vmem:[%s4966_s22 + $0x1e0] sm:$0xff] }
  0xab   : > { %1780 = vmatpush1.bf16.msra.mxu1 %v1659_v14  ;;  %v1514_v14 = vld [vmem:[%s4966_s22 + $0x1c8] sm:$0xff]  ;;  %v1675_v16 = vpack.c.bf16 %v1511_v12, %v1509_v10  ;;  %v1515_v19 = vld [vmem:[%s4966_s22 + $0x1d0] sm:$0xff]  ;;  %v1520_v23 = vld [vmem:[%s4966_s22 + $0x1f8] sm:$0xff] }
  0xac   : > { %1781 = vmatprep.subr.bf16.mxu1 %v1662_v18  ;;  %v1513_v18 = vld [vmem:[%s4966_s22 + $0x1c0] sm:$0xff]  ;;  %v1678_v20 = vpack.c.bf16 %v1516_v15, %v1514_v14  ;;  %v1519_v30 = vld [vmem:[%s4966_s22 + $0x1f0] sm:$0xff]  ;;  %v1526_v24 = vld [vmem:[%s4966_s22 + $0x228] sm:$0xff] }
  0xad   : > { %3082 = vmatpush1.bf16.msra.mxu0 %v3998_v33  ;;  %v1677_v26 = vpack.c.bf16 %v1515_v19, %v1513_v18  ;;  %v4024_v31 = vld [vmem:[%s4958_s18 + $0x204] ss:$8 sps:$4 sm:$0xff]   ;;  %v1524_v33 = vld [vmem:[%s4966_s22 + $0x218] sm:$0xff]  ;;  %v5070_v35 = vld [vmem:[%s5613_s2 + $0x10] sm:$0xff] }
  0xae   : > { %3083 = vmatprep.subr.bf16.mxu0 %v3999_v37  ;;  %v4022_v37 = vld [vmem:[%s4958_s18 + $0x200] ss:$8 sps:$4 sm:$0xff]   ;;  %v1523_v39 = vld [vmem:[%s4966_s22 + $0x210] sm:$0xff]  ;;  %v1528_v42 = vld [vmem:[%s4966_s22 + $0x238] sm:$0xff] }
  0xaf   : > { %1782 = vmatpush1.bf16.msra.mxu1 %v1661_v22  ;;  %v1518_v22 = vld [vmem:[%s4966_s22 + $0x1e8] sm:$0xff]  ;;  %v1521_v38 = vld [vmem:[%s4966_s22 + $0x200] sm:$0xff]  ;;  %v4027_v46 = vld [vmem:[%s4958_s18 + $0x210] ss:$8 sps:$4 sm:$0xff]  }
  0xb0   : > { %1783 = vmatprep.subr.bf16.mxu1 %v1664_v27  ;;  %v4019_v27 = vld [vmem:[%s4958_s18 + $0x1f0] ss:$8 sps:$4 sm:$0xff]   ;;  %v1680_v29 = vpack.c.bf16 %v1520_v23, %v1518_v22  ;;  %v1525_v47 = vld [vmem:[%s4966_s22 + $0x220] sm:$0xff]  ;;  %v1530_v51 = vld [vmem:[%s4966_s22 + $0x248] sm:$0xff] }
  0xb1   : > { %3084 = vmatpush1.bf16.msra.mxu0 %v4001_v41  ;;  %v4029_v41 = vld [vmem:[%s4958_s18 + $0x214] ss:$8 sps:$4 sm:$0xff]   ;;  %v4032_v50 = vld [vmem:[%s4958_s18 + $0x224] ss:$8 sps:$4 sm:$0xff]   ;;  %v4042_v22 = vld [vmem:[%s4958_s18 + $0x260] ss:$8 sps:$4 sm:$0xff]  }
  0xb2   : > { %3085 = vmatprep.subr.bf16.mxu0 %v4002_v45  ;;  %v1681_v45 = vpack.c.bf16 %v1523_v39, %v1521_v38  ;;  %v1529_v54 = vld [vmem:[%s4966_s22 + $0x240] sm:$0xff]  ;;  %v1531_v55 = vld [vmem:[%s4966_s22 + $0x250] sm:$0xff]  ;;  %v1534_v58 = vld [vmem:[%s4966_s22 + $0x268] sm:$0xff] }
  0xb3   : > { %1784 = vmatpush1.bf16.msra.mxu1 %v1663_v32  ;;  %v1522_v32 = vld [vmem:[%s4966_s22 + $0x208] sm:$0xff]  ;;  %v1685_v60 = vpack.c.bf16 %v1531_v55, %v1529_v54  ;;  %v1533_v62 = vld [vmem:[%s4966_s22 + $0x260] sm:$0xff]  ;;  %v1540_v3 = vld [vmem:[%s4966_s22 + $0x298] sm:$0xff] }
  0xb4   : > { %1785 = vmatprep.subr.bf16.mxu1 %v1666_v36  ;;  %v1679_v36 = vpack.c.bf16 %v1519_v30, %v1517_v28  ;;  %v1538_v2 = vld [vmem:[%s4966_s22 + $0x288] sm:$0xff]  ;;  %v1537_v6 = vld [vmem:[%s4966_s22 + $0x280] sm:$0xff]  ;;  %v1539_v7 = vld [vmem:[%s4966_s22 + $0x290] sm:$0xff] }
  0xb5   : > { %3086 = vmatpush1.bf16.msra.mxu0 %v4004_v49  ;;  %v1527_v49 = vld [vmem:[%s4966_s22 + $0x230] sm:$0xff]  ;;  %v1542_v10 = vld [vmem:[%s4966_s22 + $0x2a8] sm:$0xff]  ;;  %v1689_v12 = vpack.c.bf16 %v1539_v7, %v1537_v6  ;;  %v1541_v14 = vld [vmem:[%s4966_s22 + $0x2a0] sm:$0xff] }
  0xb6   : > { %3087 = vmatprep.subr.bf16.mxu0 %v4005_v53  ;;  %v1683_v25 = vpack.c.bf16 %v1527_v49, %v1525_v47  ;;  %v4030_v53 = vld [vmem:[%s4958_s18 + $0x220] ss:$8 sps:$4 sm:$0xff]   ;;  %v1548_v19 = vld [vmem:[%s4966_s22 + $0x2d8] sm:$0xff]  ;;  %v4050_v38 = vld [vmem:[%s4958_s18 + $0x284] ss:$8 sps:$4 sm:$0xff]  }
  0xb7   : > { %1786 = vmatpush1.bf16.msra.mxu1 %v1665_v40  ;;  %v1682_v40 = vpack.c.bf16 %v1524_v33, %v1522_v32  ;;  %v1546_v18 = vld [vmem:[%s4966_s22 + $0x2c8] sm:$0xff]  ;;  %v1545_v23 = vld [vmem:[%s4966_s22 + $0x2c0] sm:$0xff]  ;;  %v4045_v33 = vld [vmem:[%s4958_s18 + $0x270] ss:$8 sps:$4 sm:$0xff]  }
  0xb8   : > { %1787 = vmatprep.subr.bf16.mxu1 %v1668_v43  ;;  %v3596_v43 = vcombine.high %v5070_v35, %v5070_v35  ;;  %v1694_v28 = vpack.c.bf16 %v1548_v19, %v1546_v18  ;;  %v1550_v30 = vld [vmem:[%s4966_s22 + $0x2e8] sm:$0xff]  ;;  %v1560_v47 = vld [vmem:[%s4966_s22 + $0x338] sm:$0xff]  ;;  %v1573_v18 = vld [vmem:[%s4966_s22 + $0x3a0] sm:$0xff] }
  0xb9   : > { %3088 = vmatpush1.bf16.msra.mxu0 %v4007_v57  ;;  %v4035_v57 = vld [vmem:[%s4958_s18 + $0x234] ss:$8 sps:$4 sm:$0xff]   ;;  %v1554_v39 = vld [vmem:[%s4966_s22 + $0x308] sm:$0xff]  ;;  %v4051_v49 = vld [vmem:[%s4958_s18 + $0x290] ss:$8 sps:$4 sm:$0xff]  }
  0xba   : > { %3089 = vmatprep.subr.bf16.mxu0 %v4008_v61  ;;  %v4033_v61 = vld [vmem:[%s4958_s18 + $0x230] ss:$8 sps:$4 sm:$0xff]  }
  0xbb   : > { %1788 = vmatpush1.bf16.msra.mxu1 %v1667_v48  ;;  %v1684_v48 = vpack.c.bf16 %v1528_v42, %v1526_v24  ;;  %v4048_v24 = vld [vmem:[%s4958_s18 + $0x280] ss:$8 sps:$4 sm:$0xff]   ;;  %v1564_v54 = vld [vmem:[%s4966_s22 + $0x358] sm:$0xff]  ;;  %v1575_v19 = vld [vmem:[%s4966_s22 + $0x3b0] sm:$0xff] }
  0xbc   : > { %1789 = vmatprep.subr.bf16.mxu1 %v1670_v52  ;;  %v1532_v52 = vld [vmem:[%s4966_s22 + $0x258] sm:$0xff]  ;;  %v1553_v42 = vld [vmem:[%s4966_s22 + $0x300] sm:$0xff] }
  0xbd   : > { %3090 = vmatpush1.bf16.msra.mxu0 %v4010_v1  ;;  %v4038_v1 = vld [vmem:[%s4958_s18 + $0x244] ss:$8 sps:$4 sm:$0xff]   ;;  %v1572_v6 = vld [vmem:[%s4966_s22 + $0x398] sm:$0xff] }
  0xbe   : > { %3091 = vmatprep.subr.bf16.mxu0 %v4011_v5  ;;  %v4036_v5 = vld [vmem:[%s4958_s18 + $0x240] ss:$8 sps:$4 sm:$0xff]  }
  0xbf   : > { %1790 = vmatpush1.bf16.msra.mxu1 %v1669_v56  ;;  %v1686_v56 = vpack.c.bf16 %v1532_v52, %v1530_v51  ;;  %v1557_v51 = vld [vmem:[%s4966_s22 + $0x320] sm:$0xff]  ;;  %v1559_v52 = vld [vmem:[%s4966_s22 + $0x330] sm:$0xff] }
  0xc0   : > { %1791 = vmatprep.subr.bf16.mxu1 %v1672_v59  ;;  %v1536_v59 = vld [vmem:[%s4966_s22 + $0x278] sm:$0xff]  ;;  %v1699_v55 = vpack.c.bf16 %v1559_v52, %v1557_v51 }
  0xc1   : > { %3092 = vmatpush1.bf16.msra.mxu0 %v4013_v9  ;;  %v1688_v63 = vpack.c.bf16 %v1536_v59, %v1534_v58  ;;  %v4041_v9 = vld [vmem:[%s4958_s18 + $0x254] ss:$8 sps:$4 sm:$0xff]  }
  0xc2   : > { %3093 = vmatprep.subr.bf16.mxu0 %v4014_v13  ;;  %v4039_v13 = vld [vmem:[%s4958_s18 + $0x250] ss:$8 sps:$4 sm:$0xff]  }
  0xc3   : > { %1792 = vmatpush1.bf16.msra.mxu1 %v1671_v0  ;;  %v1535_v0 = vld [vmem:[%s4966_s22 + $0x270] sm:$0xff]  ;;  %v1592_v51 = vld [vmem:[%s4966_s22 + $0x438] sm:$0xff] }
  0xc4   : > { %1793 = vmatprep.subr.bf16.mxu1 %v1674_v4  ;;  %v1687_v4 = vpack.c.bf16 %v1535_v0, %v1533_v62  ;;  %v1563_v58 = vld [vmem:[%s4966_s22 + $0x350] sm:$0xff]  ;;  %v1568_v62 = vld [vmem:[%s4966_s22 + $0x378] sm:$0xff] }
  0xc5   : > { %3094 = vmatpush1.bf16.msra.mxu0 %v4016_v17  ;;  %v4044_v17 = vld [vmem:[%s4958_s18 + $0x264] ss:$8 sps:$4 sm:$0xff]   ;;  %v4057_v0 = vld [vmem:[%s4958_s18 + $0x2b0] ss:$8 sps:$4 sm:$0xff]  }
  0xc6   : > { %3095 = vmatprep.subr.bf16.mxu0 %v4017_v21 }
  0xc7   : > { %1794 = vmatpush1.bf16.msra.mxu1 %v1673_v8  ;;  %v1690_v8 = vpack.c.bf16 %v1540_v3, %v1538_v2  ;;  %v1565_v2 = vld [vmem:[%s4966_s22 + $0x360] sm:$0xff]  ;;  %v1567_v3 = vld [vmem:[%s4966_s22 + $0x370] sm:$0xff] }
  0xc8   : > { %1795 = vmatprep.subr.bf16.mxu1 %v1676_v11  ;;  %v1544_v11 = vld [vmem:[%s4966_s22 + $0x2b8] sm:$0xff]  ;;  %v1703_v7 = vpack.c.bf16 %v1567_v3, %v1565_v2  ;;  %v1598_v3 = vld [vmem:[%s4966_s22 + $0x468] sm:$0xff] }
  0xc9   : > { %3096 = vmatpush1.bf16.msra.mxu0 %v4019_v27  ;;  %v1692_v15 = vpack.c.bf16 %v1544_v11, %v1542_v10  ;;  %v1571_v10 = vld [vmem:[%s4966_s22 + $0x390] sm:$0xff] }
  0xca   : > { %3106 = vmatprep.subr.bf16.mxu0 %v4024_v31  ;;  %v1552_v31 = vld [vmem:[%s4966_s22 + $0x2f8] sm:$0xff] }
  0xcb   : > { %1796 = vmatpush1.bf16.msra.mxu1 %v1675_v16  ;;  %v1543_v16 = vld [vmem:[%s4966_s22 + $0x2b0] sm:$0xff] }
  0xcc   : > { %1797 = vmatprep.subr.bf16.mxu1 %v1678_v20  ;;  %3098 = vmatmul.mubr.bf16.vlgmr.msra.gmra.mrb[0].mxu0 %v3593_v34  ;;  %v5115_v20 = vld [vmem:[%s5614_s3 + $0x8] sm:$0xff]  ;;  %v1691_v21 = vpack.c.bf16 %v1543_v16, %v1541_v14  ;;  %v1696_v34 = vpack.c.bf16 %v1552_v31, %v1550_v30  ;;  %v1576_v14 = vld [vmem:[%s4966_s22 + $0x3b8] sm:$0xff] }
  0xcd   : > { %3107 = vmatpush1.bf16.msra.mxu0 %v4022_v37  ;;  %3138 = vmatprep.mubr.bf16.mxu0 %v3596_v43  ;;  %v3588_v27 = vcombine.high %v5115_v20, %v5115_v20  ;;  %v1551_v37 = vld [vmem:[%s4966_s22 + $0x2f0] sm:$0xff] }
  0xce   : > { %3108 = vmatprep.subr.bf16.mxu0 %v4029_v41  ;;  %v1555_v43 = vld [vmem:[%s4966_s22 + $0x310] sm:$0xff] }
  0xcf   : > { %1798 = vmatpush1.bf16.msra.mxu1 %v1677_v26  ;;  %v1547_v26 = vld [vmem:[%s4966_s22 + $0x2d0] sm:$0xff] }
  0xd0   : > { %1799 = vmatprep.subr.bf16.mxu1 %v1680_v29  ;;  %v4047_v29 = vld [vmem:[%s4958_s18 + $0x274] ss:$8 sps:$4 sm:$0xff]   ;;  %v1693_v32 = vpack.c.bf16 %v1547_v26, %v1545_v23  ;;  %v4063_v16 = vld [vmem:[%s4958_s18 + $0x2d0] ss:$8 sps:$4 sm:$0xff]   ;;  %v1707_v26 = vpack.c.bf16 %v1575_v19, %v1573_v18  ;;  %v1606_v19 = vld [vmem:[%s4966_s22 + $0x4a8] sm:$0xff] }
  0xd1   : > { %3109 = vmatpush1.bf16.msra.mxu0 %v4027_v46  ;;  %v1558_v46 = vld [vmem:[%s4966_s22 + $0x328] sm:$0xff]  ;;  %v1580_v23 = vld [vmem:[%s4966_s22 + $0x3d8] sm:$0xff] }
  0xd2   : > { %3110 = vmatprep.subr.bf16.mxu0 %v4032_v50  ;;  %v1700_v50 = vpack.c.bf16 %v1560_v47, %v1558_v46  ;;  %v4071_v31 = vld [vmem:[%s4958_s18 + $0x2f4] ss:$8 sps:$4 sm:$0xff]  }
  0xd3   : > { %1800 = vmatpush1.bf16.msra.mxu1 %v1679_v36  ;;  %v1549_v36 = vld [vmem:[%s4966_s22 + $0x2e0] sm:$0xff]  ;;  %v1587_v46 = vld [vmem:[%s4966_s22 + $0x410] sm:$0xff] }
  0xd4   : > { %1810 = vmatprep.subr.bf16.mxu1 %v1682_v40  ;;  %v1556_v40 = vld [vmem:[%s4966_s22 + $0x318] sm:$0xff]  ;;  %v1695_v41 = vpack.c.bf16 %v1551_v37, %v1549_v36 }
  0xd5   : > { %3111 = vmatpush1.bf16.msra.mxu0 %v4030_v53  ;;  %v1562_v53 = vld [vmem:[%s4966_s22 + $0x348] sm:$0xff]  ;;  %v4069_v36 = vld [vmem:[%s4958_s18 + $0x2f0] ss:$8 sps:$4 sm:$0xff]   ;;  %v4087_v2 = vld [vmem:[%s4958_s18 + $0x334] ss:$8 sps:$4 sm:$0xff]  }
  0xd6   : > { %1802 = vmatmul.mubr.bf16.vlgmr.msra.gmra.mrb[0].mxu1 %v3585_v44  ;;  %3112 = vmatprep.subr.bf16.mxu0 %v4035_v57  ;;  %v1698_v44 = vpack.c.bf16 %v1556_v40, %v1554_v39  ;;  %v1561_v57 = vld [vmem:[%s4966_s22 + $0x340] sm:$0xff]  ;;  %v1702_v59 = vpack.c.bf16 %v1564_v54, %v1562_v53  ;;  %v1583_v39 = vld [vmem:[%s4966_s22 + $0x3f0] sm:$0xff] }
  0xd7   : > { %1811 = vmatpush1.bf16.msra.mxu1 %v1681_v45  ;;  %1842 = vmatprep.mubr.bf16.mxu1 %v3588_v27  ;;  %v4053_v45 = vld [vmem:[%s4958_s18 + $0x294] ss:$8 sps:$4 sm:$0xff]   ;;  %v4066_v27 = vld [vmem:[%s4958_s18 + $0x2e0] ss:$8 sps:$4 sm:$0xff]   ;;  %v4076_v40 = vld [vmem:[%s4958_s18 + $0x304] ss:$8 sps:$4 sm:$0xff]  }
  0xd8   : > { %1812 = vmatprep.subr.bf16.mxu1 %v1684_v48  ;;  %v1697_v48 = vpack.c.bf16 %v1555_v43, %v1553_v42  ;;  %v3595_v42 = vcombine.low %v5070_v35, %v5070_v35  ;;  %v1590_v35 = vld [vmem:[%s4966_s22 + $0x428] sm:$0xff]  ;;  %v5200_v53 = vld [vmem:[%s5614_s3 + $0x10] sm:$0xff] }
  0xd9   : > { %3113 = vmatpush1.bf16.msra.mxu0 %v4033_v61  ;;  %v1566_v61 = vld [vmem:[%s4966_s22 + $0x368] sm:$0xff]  ;;  %v4093_v18 = vld [vmem:[%s4958_s18 + $0x354] ss:$8 sps:$4 sm:$0xff]  }
  0xda   : > { %3114 = vmatprep.subr.bf16.mxu0 %v4038_v1  ;;  %v1704_v1 = vpack.c.bf16 %v1568_v62, %v1566_v61  ;;  %v4082_v61 = vld [vmem:[%s4958_s18 + $0x320] ss:$8 sps:$4 sm:$0xff]  }
  0xdb   : > { %1813 = vmatpush1.bf16.msra.mxu1 %v1683_v25  ;;  %v4056_v25 = vld [vmem:[%s4958_s18 + $0x2a4] ss:$8 sps:$4 sm:$0xff]  }
  0xdc   : > { %1814 = vmatprep.subr.bf16.mxu1 %v1686_v56  ;;  %v4054_v56 = vld [vmem:[%s4958_s18 + $0x2a0] ss:$8 sps:$4 sm:$0xff]  }
  0xdd   : > { %3115 = vmatpush1.bf16.msra.mxu0 %v4036_v5  ;;  %v1570_v5 = vld [vmem:[%s4966_s22 + $0x388] sm:$0xff] }
  0xde   : > { %3116 = vmatprep.subr.bf16.mxu0 %v4041_v9  ;;  %v1569_v9 = vld [vmem:[%s4966_s22 + $0x380] sm:$0xff]  ;;  %v1706_v11 = vpack.c.bf16 %v1572_v6, %v1570_v5  ;;  %v4085_v5 = vld [vmem:[%s4958_s18 + $0x330] ss:$8 sps:$4 sm:$0xff]  }
  0xdf   : > { %1815 = vmatpush1.bf16.msra.mxu1 %v1685_v60  ;;  %v4059_v60 = vld [vmem:[%s4958_s18 + $0x2b4] ss:$8 sps:$4 sm:$0xff]  }
  0xe0   : > { %1816 = vmatprep.subr.bf16.mxu1 %v1688_v63  ;;  %v1701_v63 = vpack.c.bf16 %v1563_v58, %v1561_v57  ;;  %v1716_v57 = vpack.c.bf16 %v1592_v51, %v1590_v35  ;;  %v4084_v58 = vld [vmem:[%s4958_s18 + $0x324] ss:$8 sps:$4 sm:$0xff]   ;;  %v1619_v51 = vld [vmem:[%s4966_s22 + $0x510] sm:$0xff] }
  0xe1   : > { %3117 = vmatpush1.bf16.msra.mxu0 %v4039_v13  ;;  %v1574_v13 = vld [vmem:[%s4966_s22 + $0x3a8] sm:$0xff]  ;;  %v1617_v35 = vld [vmem:[%s4966_s22 + $0x500] sm:$0xff] }
  0xe2   : > { %3118 = vmatprep.subr.bf16.mxu0 %v4044_v17  ;;  %v1708_v17 = vpack.c.bf16 %v1576_v14, %v1574_v13  ;;  %v4088_v13 = vld [vmem:[%s4958_s18 + $0x340] ss:$8 sps:$4 sm:$0xff]  }
  0xe3   : > { %1817 = vmatpush1.bf16.msra.mxu1 %v1687_v4  ;;  %v4062_v4 = vld [vmem:[%s4958_s18 + $0x2c4] ss:$8 sps:$4 sm:$0xff]  }
  0xe4   : > { %1818 = vmatprep.subr.bf16.mxu1 %v1690_v8  ;;  %v4060_v8 = vld [vmem:[%s4958_s18 + $0x2c0] ss:$8 sps:$4 sm:$0xff]  }
  0xe5   : > { %3119 = vmatpush1.bf16.msra.mxu0 %v4042_v22  ;;  %v1578_v22 = vld [vmem:[%s4966_s22 + $0x3c8] sm:$0xff] }
  0xe6   : > { %3120 = vmatprep.subr.bf16.mxu0 %v4047_v29  ;;  %v1579_v29 = vld [vmem:[%s4966_s22 + $0x3d0] sm:$0xff]  ;;  %v1710_v30 = vpack.c.bf16 %v1580_v23, %v1578_v22 }
  0xe7   : > { %1819 = vmatpush1.bf16.msra.mxu1 %v1689_v12  ;;  %v4065_v12 = vld [vmem:[%s4958_s18 + $0x2d4] ss:$8 sps:$4 sm:$0xff]   ;;  %v4091_v22 = vld [vmem:[%s4958_s18 + $0x350] ss:$8 sps:$4 sm:$0xff]  }
  0xe8   : > { %1820 = vmatprep.subr.bf16.mxu1 %v1692_v15  ;;  %v1705_v15 = vpack.c.bf16 %v1571_v10, %v1569_v9  ;;  %v4090_v10 = vld [vmem:[%s4958_s18 + $0x344] ss:$8 sps:$4 sm:$0xff]  }
  0xe9   : > { %3121 = vmatpush1.bf16.msra.mxu0 %v4045_v33  ;;  %v1584_v33 = vld [vmem:[%s4966_s22 + $0x3f8] sm:$0xff] }
  0xea   : > { %3122 = vmatprep.subr.bf16.mxu0 %v4050_v38  ;;  %v1581_v38 = vld [vmem:[%s4966_s22 + $0x3e0] sm:$0xff] }
  0xeb   : > { %1821 = vmatpush1.bf16.msra.mxu1 %v1691_v21  ;;  %v4068_v21 = vld [vmem:[%s4958_s18 + $0x2e4] ss:$8 sps:$4 sm:$0xff]   ;;  %v1711_v43 = vpack.c.bf16 %v1583_v39, %v1581_v38  ;;  %v4099_v38 = vld [vmem:[%s4958_s18 + $0x374] ss:$8 sps:$4 sm:$0xff]  }
  0xec   : > { %1822 = vmatprep.subr.bf16.mxu1 %v1694_v28  ;;  %v1577_v28 = vld [vmem:[%s4966_s22 + $0x3c0] sm:$0xff]  ;;  %v1614_v39 = vld [vmem:[%s4966_s22 + $0x4e8] sm:$0xff] }
  0xed   : > { %3123 = vmatpush1.bf16.msra.mxu0 %v4048_v24  ;;  %v1588_v24 = vld [vmem:[%s4966_s22 + $0x418] sm:$0xff] }
  0xee   : > { %3124 = vmatprep.subr.bf16.mxu0 %v4053_v45  ;;  %v1585_v45 = vld [vmem:[%s4966_s22 + $0x400] sm:$0xff] }
  0xef   : > { %1823 = vmatpush1.bf16.msra.mxu1 %v1693_v32  ;;  %v1582_v32 = vld [vmem:[%s4966_s22 + $0x3e8] sm:$0xff]  ;;  %v1713_v54 = vpack.c.bf16 %v1587_v46, %v1585_v45 }
  0xf0   : > { %1824 = vmatprep.subr.bf16.mxu1 %v1696_v34  ;;  %v1709_v34 = vpack.c.bf16 %v1579_v29, %v1577_v28  ;;  %v1712_v37 = vpack.c.bf16 %v1584_v33, %v1582_v32  ;;  %v4096_v29 = vld [vmem:[%s4958_s18 + $0x364] ss:$8 sps:$4 sm:$0xff]   ;;  %v4094_v32 = vld [vmem:[%s4958_s18 + $0x360] ss:$8 sps:$4 sm:$0xff]  }
  0xf1   : > { %3125 = vmatpush1.bf16.msra.mxu0 %v4051_v49  ;;  %v5188_v49 = vld [vmem:[%s5613_s2 + $0x18] sm:$0xff]  ;;  %v4102_v45 = vld [vmem:[%s4958_s18 + $0x384] ss:$8 sps:$4 sm:$0xff]  }
  0xf2   : > { %3126 = vmatprep.subr.bf16.mxu0 %v4056_v25  ;;  %v3598_v52 = vcombine.high %v5188_v49, %v5188_v49  ;;  %v3587_v25 = vcombine.low %v5115_v20, %v5115_v20  ;;  %v1594_v20 = vld [vmem:[%s4966_s22 + $0x448] sm:$0xff] }
  0xf3   : > { %1825 = vmatpush1.bf16.msra.mxu1 %v1695_v41  ;;  %v1586_v41 = vld [vmem:[%s4966_s22 + $0x408] sm:$0xff] }
  0xf4   : > { %1826 = vmatprep.subr.bf16.mxu1 %v1698_v44  ;;  %v4074_v44 = vld [vmem:[%s4958_s18 + $0x300] ss:$8 sps:$4 sm:$0xff]   ;;  %v1714_v47 = vpack.c.bf16 %v1588_v24, %v1586_v41  ;;  %v4097_v41 = vld [vmem:[%s4958_s18 + $0x370] ss:$8 sps:$4 sm:$0xff]  }
  0xf5   : > { %3127 = vmatpush1.bf16.msra.mxu0 %v4054_v56  ;;  %v1591_v56 = vld [vmem:[%s4966_s22 + $0x430] sm:$0xff]  ;;  %v1618_v46 = vld [vmem:[%s4966_s22 + $0x508] sm:$0xff] }
  0xf6   : > { %3128 = vmatprep.subr.bf16.mxu0 %v4059_v60  ;;  %v3590_v60 = vcombine.high %v5200_v53, %v5200_v53 }
  0xf7   : > { %1827 = vmatpush1.bf16.msra.mxu1 %v1697_v48  ;;  %v4081_v48 = vld [vmem:[%s4958_s18 + $0x314] ss:$8 sps:$4 sm:$0xff]  }
  0xf8   : > { %1828 = vmatprep.subr.bf16.mxu1 %v1700_v50  ;;  %v4079_v50 = vld [vmem:[%s4958_s18 + $0x310] ss:$8 sps:$4 sm:$0xff]  }
  0xf9   : > { %3129 = vmatpush1.bf16.msra.mxu0 %v4057_v0  ;;  %v1595_v0 = vld [vmem:[%s4966_s22 + $0x450] sm:$0xff] }
  0xfa   : > { %3130 = vmatprep.subr.bf16.mxu0 %v4062_v4  ;;  %v1600_v4 = vld [vmem:[%s4966_s22 + $0x478] sm:$0xff] }
  0xfb   : > { %1829 = vmatpush1.bf16.msra.mxu1 %v1699_v55  ;;  %v1589_v55 = vld [vmem:[%s4966_s22 + $0x420] sm:$0xff]  ;;  %v1720_v9 = vpack.c.bf16 %v1600_v4, %v1598_v3  ;;  %v4111_v4 = vld [vmem:[%s4958_s18 + $0x3b4] ss:$8 sps:$4 sm:$0xff]  }
  0xfc   : > { %1830 = vmatprep.subr.bf16.mxu1 %v1702_v59  ;;  %v1596_v59 = vld [vmem:[%s4966_s22 + $0x458] sm:$0xff]  ;;  %v1715_v62 = vpack.c.bf16 %v1591_v56, %v1589_v55 }
  0xfd   : > { %3131 = vmatpush1.bf16.msra.mxu0 %v4060_v8  ;;  %v1599_v8 = vld [vmem:[%s4966_s22 + $0x470] sm:$0xff]  ;;  %v1624_v55 = vld [vmem:[%s4966_s22 + $0x538] sm:$0xff] }
  0xfe   : > { %3132 = vmatprep.subr.bf16.mxu0 %v4065_v12  ;;  %v1604_v12 = vld [vmem:[%s4966_s22 + $0x498] sm:$0xff] }
  0xff   : > { %1831 = vmatpush1.bf16.msra.mxu1 %v1701_v63  ;;  %v1593_v63 = vld [vmem:[%s4966_s22 + $0x440] sm:$0xff]  ;;  %v4103_v56 = vld [vmem:[%s4958_s18 + $0x390] ss:$8 sps:$4 sm:$0xff]  }
 0x100   : > { %1832 = vmatprep.subr.bf16.mxu1 %v1704_v1  ;;  %v1718_v1 = vpack.c.bf16 %v1596_v59, %v1594_v20  ;;  %v1717_v6 = vpack.c.bf16 %v1595_v0, %v1593_v63  ;;  %v1623_v20 = vld [vmem:[%s4966_s22 + $0x530] sm:$0xff]  ;;  %v4106_v63 = vld [vmem:[%s4958_s18 + $0x3a0] ss:$8 sps:$4 sm:$0xff]  }
 0x101   : > { %3133 = vmatpush1.bf16.msra.mxu0 %v4063_v16  ;;  %v1603_v16 = vld [vmem:[%s4966_s22 + $0x490] sm:$0xff] }
 0x102   : > { %3134 = vmatprep.subr.bf16.mxu0 %v4068_v21  ;;  %v1608_v21 = vld [vmem:[%s4966_s22 + $0x4b8] sm:$0xff] }
 0x103   : > { %1833 = vmatpush1.bf16.msra.mxu1 %v1703_v7  ;;  %v1597_v7 = vld [vmem:[%s4966_s22 + $0x460] sm:$0xff]  ;;  %v1724_v28 = vpack.c.bf16 %v1608_v21, %v1606_v19  ;;  %v4117_v21 = vld [vmem:[%s4958_s18 + $0x3d4] ss:$8 sps:$4 sm:$0xff]  }
 0x104   : > { %1834 = vmatprep.subr.bf16.mxu1 %v1706_v11  ;;  %v1602_v11 = vld [vmem:[%s4966_s22 + $0x488] sm:$0xff]  ;;  %v1719_v14 = vpack.c.bf16 %v1599_v8, %v1597_v7  ;;  %v4109_v8 = vld [vmem:[%s4958_s18 + $0x3b0] ss:$8 sps:$4 sm:$0xff]  }
 0x105   : > { %3135 = vmatpush1.bf16.msra.mxu0 %v4066_v27  ;;  %v1607_v27 = vld [vmem:[%s4966_s22 + $0x4b0] sm:$0xff] }
 0x106   : > { %3136 = vmatprep.subr.bf16.mxu0 %v4071_v31  ;;  %v1612_v31 = vld [vmem:[%s4966_s22 + $0x4d8] sm:$0xff] }
 0x107   : > { %1835 = vmatpush1.bf16.msra.mxu1 %v1705_v15  ;;  %v1601_v15 = vld [vmem:[%s4966_s22 + $0x480] sm:$0xff] }
 0x108   : > { %1836 = vmatprep.subr.bf16.mxu1 %v1708_v17  ;;  %v1722_v17 = vpack.c.bf16 %v1604_v12, %v1602_v11  ;;  %v1721_v23 = vpack.c.bf16 %v1603_v16, %v1601_v15  ;;  %v4114_v12 = vld [vmem:[%s4958_s18 + $0x3c4] ss:$8 sps:$4 sm:$0xff]   ;;  %v4112_v15 = vld [vmem:[%s4958_s18 + $0x3c0] ss:$8 sps:$4 sm:$0xff]  }
 0x109   : > { %3137 = vmatpush1.bf16.msra.mxu0 %v4069_v36  ;;  %v1611_v36 = vld [vmem:[%s4966_s22 + $0x4d0] sm:$0xff]  ;;  %v1633_v16 = vld [vmem:[%s4966_s22 + $0x580] sm:$0xff] }
 0x10a   : > { %3147 = vmatprep.subr.bf16.mxu0 %v4076_v40  ;;  %v1616_v40 = vld [vmem:[%s4966_s22 + $0x4f8] sm:$0xff] }
 0x10b   : > { %1837 = vmatpush1.bf16.msra.mxu1 %v1707_v26  ;;  %v1605_v26 = vld [vmem:[%s4966_s22 + $0x4a0] sm:$0xff] }
 0x10c   : > { %1838 = vmatprep.subr.bf16.mxu1 %v1710_v30  ;;  %3139 = vmatmul.mubr.bf16.vlgmr.msra.gmra.mrb[0].mxu0 %v3595_v42  ;;  %v1610_v30 = vld [vmem:[%s4966_s22 + $0x4c8] sm:$0xff]  ;;  %v1723_v33 = vpack.c.bf16 %v1607_v27, %v1605_v26  ;;  %v1613_v42 = vld [vmem:[%s4966_s22 + $0x4e0] sm:$0xff]  ;;  %v4115_v26 = vld [vmem:[%s4958_s18 + $0x3d0] ss:$8 sps:$4 sm:$0xff]  }
 0x10d   : > { %3148 = vmatpush1.bf16.msra.mxu0 %v4074_v44  ;;  %3179 = vmatprep.mubr.bf16.mxu0 %v3598_v52  ;;  %v1728_v44 = vpack.c.bf16 %v1616_v40, %v1614_v39  ;;  %v1637_v27 = vld [vmem:[%s4966_s22 + $0x5a0] sm:$0xff]  ;;  %v4123_v40 = vld [vmem:[%s4958_s18 + $0x3f4] ss:$8 sps:$4 sm:$0xff]  }
 0x10e   : > { %3149 = vmatprep.subr.bf16.mxu0 %v4081_v48  ;;  %v4100_v48 = vld [vmem:[%s4958_s18 + $0x380] ss:$8 sps:$4 sm:$0xff]  }
 0x10f   : > { %1839 = vmatpush1.bf16.msra.mxu1 %v1709_v34  ;;  %v1609_v34 = vld [vmem:[%s4966_s22 + $0x4c0] sm:$0xff] }
 0x110   : > { %1840 = vmatprep.subr.bf16.mxu1 %v1712_v37  ;;  %v1726_v37 = vpack.c.bf16 %v1612_v31, %v1610_v30  ;;  %v1725_v24 = vpack.c.bf16 %v1611_v36, %v1609_v34  ;;  %v4120_v31 = vld [vmem:[%s4958_s18 + $0x3e4] ss:$8 sps:$4 sm:$0xff]   ;;  %v4118_v34 = vld [vmem:[%s4958_s18 + $0x3e0] ss:$8 sps:$4 sm:$0xff]  }
 0x111   : > { %3150 = vmatpush1.bf16.msra.mxu0 %v4079_v50  ;;  %v1641_v36 = vld [vmem:[%s4966_s22 + $0x5c0] sm:$0xff] }
 0x112   : > { %3151 = vmatprep.subr.bf16.mxu0 %v4084_v58  ;;  %v1621_v58 = vld [vmem:[%s4966_s22 + $0x520] sm:$0xff] }
 0x113   : > { %1841 = vmatpush1.bf16.msra.mxu1 %v1711_v43  ;;  %v1615_v43 = vld [vmem:[%s4966_s22 + $0x4f0] sm:$0xff]  ;;  %v1731_v0 = vpack.c.bf16 %v1623_v20, %v1621_v58  ;;  %v4142_v20 = vld [vmem:[%s4958_s18 + $0x424] ss:$8 sps:$4 sm:$0xff]  }
 0x114   : > { %1851 = vmatprep.subr.bf16.mxu1 %v1714_v47  ;;  %v1620_v47 = vld [vmem:[%s4966_s22 + $0x518] sm:$0xff]  ;;  %v1727_v50 = vpack.c.bf16 %v1615_v43, %v1613_v42  ;;  %v1645_v43 = vld [vmem:[%s4966_s22 + $0x5e0] sm:$0xff] }
 0x115   : > { %3152 = vmatpush1.bf16.msra.mxu0 %v4082_v61  ;;  %v1730_v52 = vpack.c.bf16 %v1620_v47, %v1618_v46  ;;  %v1626_v61 = vld [vmem:[%s4966_s22 + $0x548] sm:$0xff]  ;;  %v4121_v42 = vld [vmem:[%s4958_s18 + $0x3f0] ss:$8 sps:$4 sm:$0xff]   ;;  %v4139_v58 = vld [vmem:[%s4958_s18 + $0x14] ss:$8 sps:$4 sm:$0xff]  }
 0x116   : > { %1843 = vmatmul.mubr.bf16.vlgmr.msra.gmra.mrb[0].mxu1 %v3587_v25  ;;  %3153 = vmatprep.subr.bf16.mxu0 %v4087_v2  ;;  %v4105_v25 = vld [vmem:[%s4958_s18 + $0x394] ss:$8 sps:$4 sm:$0xff]   ;;  %v4128_v47 = vld [vmem:[%s4958_s18 + $0x404] ss:$8 sps:$4 sm:$0xff]  }
 0x117   : > { %1852 = vmatpush1.bf16.msra.mxu1 %v1713_v54  ;;  %1883 = vmatprep.mubr.bf16.mxu1 %v3590_v60  ;;  %v1622_v54 = vld [vmem:[%s4966_s22 + $0x528] sm:$0xff]  ;;  %v1627_v2 = vld [vmem:[%s4966_s22 + $0x550] sm:$0xff] }
 0x118   : > { %1853 = vmatprep.subr.bf16.mxu1 %v1716_v57  ;;  %v1729_v57 = vpack.c.bf16 %v1619_v51, %v1617_v35  ;;  %v1732_v59 = vpack.c.bf16 %v1624_v55, %v1622_v54  ;;  %v4108_v60 = vld [vmem:[%s4958_s18 + $0x3a4] ss:$8 sps:$4 sm:$0xff]   ;;  %v4131_v54 = vld [vmem:[%s4958_s18] ss:$8 sps:$4 sm:$0xff]  }
 0x119   : > { %3154 = vmatpush1.bf16.msra.mxu0 %v4085_v5  ;;  %v1630_v5 = vld [vmem:[%s4966_s22 + $0x568] sm:$0xff]  ;;  %v5297_v35 = vld [vmem:[%s5613_s2 + $0x20] sm:$0xff] }
 0x11a   : > { %3155 = vmatprep.subr.bf16.mxu0 %v4090_v10  ;;  %v1631_v10 = vld [vmem:[%s4966_s22 + $0x570] sm:$0xff]  ;;  %v3600_v55 = vcombine.high %v5297_v35, %v5297_v35 }
 0x11b   : > { %1854 = vmatpush1.bf16.msra.mxu1 %v1715_v62  ;;  %v1628_v62 = vld [vmem:[%s4966_s22 + $0x558] sm:$0xff] }
 0x11c   : > { %1855 = vmatprep.subr.bf16.mxu1 %v1718_v1  ;;  %v1625_v1 = vld [vmem:[%s4966_s22 + $0x540] sm:$0xff]  ;;  %v1734_v3 = vpack.c.bf16 %v1628_v62, %v1626_v61 }
 0x11d   : > { %3156 = vmatpush1.bf16.msra.mxu0 %v4088_v13  ;;  %v1733_v7 = vpack.c.bf16 %v1627_v2, %v1625_v1  ;;  %v1634_v13 = vld [vmem:[%s4966_s22 + $0x588] sm:$0xff]  ;;  %v4146_v1 = vld [vmem:[%s4958_s18 + $0x430] ss:$8 sps:$4 sm:$0xff]   ;;  %v4151_v2 = vld [vmem:[%s4958_s18 + $0x34] ss:$8 sps:$4 sm:$0xff]  }
 0x11e   : > { %3157 = vmatprep.subr.bf16.mxu0 %v4093_v18  ;;  %v1635_v18 = vld [vmem:[%s4966_s22 + $0x590] sm:$0xff]  ;;  %v4140_v61 = vld [vmem:[%s4958_s18 + $0x420] ss:$8 sps:$4 sm:$0xff]   ;;  %v4145_v62 = vld [vmem:[%s4958_s18 + $0x24] ss:$8 sps:$4 sm:$0xff]  }
 0x11f   : > { %1856 = vmatpush1.bf16.msra.mxu1 %v1717_v6  ;;  %v1632_v6 = vld [vmem:[%s4966_s22 + $0x578] sm:$0xff] }
 0x120   : > { %1857 = vmatprep.subr.bf16.mxu1 %v1720_v9  ;;  %v1629_v9 = vld [vmem:[%s4966_s22 + $0x560] sm:$0xff]  ;;  %v1736_v11 = vpack.c.bf16 %v1632_v6, %v1630_v5 }
 0x121   : > { %3158 = vmatpush1.bf16.msra.mxu0 %v4091_v22  ;;  %v1638_v22 = vld [vmem:[%s4966_s22 + $0x5a8] sm:$0xff] }
 0x122   : > { %3159 = vmatprep.subr.bf16.mxu0 %v4096_v29  ;;  %v1639_v29 = vld [vmem:[%s4966_s22 + $0x5b0] sm:$0xff]  ;;  %v4152_v5 = vld [vmem:[%s4958_s18 + $0x440] ss:$8 sps:$4 sm:$0xff]   ;;  %v4157_v6 = vld [vmem:[%s4958_s18 + $0x44] ss:$8 sps:$4 sm:$0xff]  }
 0x123   : > { %1858 = vmatpush1.bf16.msra.mxu1 %v1719_v14  ;;  %v1636_v14 = vld [vmem:[%s4966_s22 + $0x598] sm:$0xff] }
 0x124   : > { %1859 = vmatprep.subr.bf16.mxu1 %v1722_v17  ;;  %v1735_v17 = vpack.c.bf16 %v1631_v10, %v1629_v9  ;;  %v1738_v19 = vpack.c.bf16 %v1636_v14, %v1634_v13  ;;  %v4155_v9 = vld [vmem:[%s4958_s18 + $0x40] ss:$8 sps:$4 sm:$0xff]   ;;  %v4158_v10 = vld [vmem:[%s4958_s18 + $0x450] ss:$8 sps:$4 sm:$0xff]  }
 0x125   : > { %3160 = vmatpush1.bf16.msra.mxu0 %v4094_v32  ;;  %v1642_v32 = vld [vmem:[%s4966_s22 + $0x5c8] sm:$0xff]  ;;  %v3311_v13 = vld [vmem:[%s5615_s4] sm:$0x1]  ;;  %v4161_v14 = vld [vmem:[%s4958_s18 + $0x50] ss:$8 sps:$4 sm:$0xff]  }
 0x126   : > { %3161 = vmatprep.subr.bf16.mxu0 %v4099_v38  ;;  %v1643_v38 = vld [vmem:[%s4966_s22 + $0x5d0] sm:$0xff] }
 0x127   : > { %1860 = vmatpush1.bf16.msra.mxu1 %v1721_v23  ;;  %v1640_v23 = vld [vmem:[%s4966_s22 + $0x5b8] sm:$0xff] }
 0x128   : > { %1861 = vmatprep.subr.bf16.mxu1 %v1724_v28  ;;  %v1737_v28 = vpack.c.bf16 %v1635_v18, %v1633_v16  ;;  %v1740_v30 = vpack.c.bf16 %v1640_v23, %v1638_v22  ;;  %v4169_v16 = vld [vmem:[%s4958_s18 + $0x64] ss:$8 sps:$4 sm:$0xff]   ;;  %v4167_v18 = vld [vmem:[%s4958_s18 + $0x60] ss:$8 sps:$4 sm:$0xff]   ;;  %v4173_v23 = vld [vmem:[%s4958_s18 + $0x70] ss:$8 sps:$4 sm:$0xff]  }
 0x129   : > { %3162 = vmatpush1.bf16.msra.mxu0 %v4097_v41  ;;  %v1646_v41 = vld [vmem:[%s4966_s22 + $0x5e8] sm:$0xff] }
 0x12a   : > { %3163 = vmatprep.subr.bf16.mxu0 %v4102_v45  ;;  %v1647_v45 = vld [vmem:[%s4966_s22 + $0x5f0] sm:$0xff]  ;;  %v4178_v22 = vld [vmem:[%s4958_s18 + $0x484] ss:$8 sps:$4 sm:$0xff]  }
 0x12b   : > { %1862 = vmatpush1.bf16.msra.mxu1 %v1723_v33  ;;  %v1644_v33 = vld [vmem:[%s4966_s22 + $0x5d8] sm:$0xff]  ;;  %v1743_v51 = vpack.c.bf16 %v1647_v45, %v1645_v43  ;;  %v4205_v43 = vld [vmem:[%s4958_s18 + $0xc4] ss:$8 sps:$4 sm:$0xff]   ;;  %v4203_v45 = vld [vmem:[%s4958_s18 + $0xc0] ss:$8 sps:$4 sm:$0xff]  }
 0x12c   : > { %1863 = vmatprep.subr.bf16.mxu1 %v1726_v37  ;;  %v1739_v37 = vpack.c.bf16 %v1639_v29, %v1637_v27  ;;  %v1742_v39 = vpack.c.bf16 %v1644_v33, %v1642_v32  ;;  %v4181_v27 = vld [vmem:[%s4958_s18 + $0x84] ss:$8 sps:$4 sm:$0xff]   ;;  %v4179_v29 = vld [vmem:[%s4958_s18 + $0x80] ss:$8 sps:$4 sm:$0xff]   ;;  %v4185_v33 = vld [vmem:[%s4958_s18 + $0x90] ss:$8 sps:$4 sm:$0xff]  }
 0x12d   : > { %3164 = vmatpush1.bf16.msra.mxu0 %v4100_v48  ;;  %v3597_v48 = vcombine.low %v5188_v49, %v5188_v49  ;;  %v3589_v49 = vcombine.low %v5200_v53, %v5200_v53  ;;  %v4190_v32 = vld [vmem:[%s4958_s18 + $0x4a4] ss:$8 sps:$4 sm:$0xff]  }
 0x12e   : > { %3165 = vmatprep.subr.bf16.mxu0 %v4105_v25  ;;  %v4136_v25 = vld [vmem:[%s4958_s18 + $0x414] ss:$8 sps:$4 sm:$0xff]  }
 0x12f   : > { %1864 = vmatpush1.bf16.msra.mxu1 %v1725_v24  ;;  %v1648_v24 = vld [vmem:[%s4966_s22 + $0x5f8] sm:$0xff]  ;;  %s4338_s22 = scalar_lea.vmem %s4337_s23, 32 }
 0x130   : > { %1865 = vmatprep.subr.bf16.mxu1 %v1728_v44  ;;  %v1741_v44 = vpack.c.bf16 %v1643_v38, %v1641_v36  ;;  %v1744_v46 = vpack.c.bf16 %v1648_v24, %v1646_v41  ;;  %v4193_v36 = vld [vmem:[%s4958_s18 + $0xa4] ss:$8 sps:$4 sm:$0xff]   ;;  %v4191_v38 = vld [vmem:[%s4958_s18 + $0xa0] ss:$8 sps:$4 sm:$0xff]   ;;  %v4197_v24 = vld [vmem:[%s4958_s18 + $0xb0] ss:$8 sps:$4 sm:$0xff]   ;;  %p4340_p4 = scmp.lt.s32.totalorder %s4338_s22, %s4332_s21 }
 0x131   : > { %3166 = vmatpush1.bf16.msra.mxu0 %v4103_v56  ;;  %v4134_v56 = vld [vmem:[%s4958_s18 + $0x410] ss:$8 sps:$4 sm:$0xff]   ;;  %v4202_v41 = vld [vmem:[%s4958_s18 + $0x4c4] ss:$8 sps:$4 sm:$0xff]  }
 0x132   : > { %3167 = vmatprep.subr.bf16.mxu0 %v4108_v60  ;;  %v4137_v60 = vld [vmem:[%s4958_s18 + $0x10] ss:$8 sps:$4 sm:$0xff]   ;;  %p4341_p5 = por %p4340_p4, %p4339_p3 }
 0x133   : > { %1866 = vmatpush1.bf16.msra.mxu1 %v1727_v50  ;;  %v4126_v50 = vld [vmem:[%s4958_s18 + $0x400] ss:$8 sps:$4 sm:$0xff]  }
 0x134   : > { %1867 = vmatprep.subr.bf16.mxu1 %v1730_v52  ;;  %v4133_v52 = vld [vmem:[%s4958_s18 + $0x4] ss:$8 sps:$4 sm:$0xff]   ;;  %p4342_p7 = pnand %p4341_p5, %p4335_p2 }
 0x135   : > { %3168 = vmatpush1.bf16.msra.mxu0 %v4106_v63  ;;  %v4148_v63 = vld [vmem:[%s4958_s18 + $0x434] ss:$8 sps:$4 sm:$0xff]  }
 0x136   : > { %3169 = vmatprep.subr.bf16.mxu0 %v4111_v4  ;;  %v4149_v4 = vld [vmem:[%s4958_s18 + $0x30] ss:$8 sps:$4 sm:$0xff]  }
 0x137   : > { %1868 = vmatpush1.bf16.msra.mxu1 %v1729_v57  ;;  %v5310_v57 = vld [vmem:[%s5613_s2] sm:$0xff] }
 0x138   : > { %1869 = vmatprep.subr.bf16.mxu1 %v1732_v59  ;;  %v3592_v53 = vcombine.high %v5310_v57, %v5310_v57  ;;  %v4396_v59 = vmov 0  }
 0x139   : > { %3170 = vmatpush1.bf16.msra.mxu0 %v4109_v8  ;;  %3971 = vset.pattern.permute.xlu0 %v4396_v59  ;;  %v3319_v8 = vld [vmem:[%s5615_s4 + $0x1] sm:$0x1] }
 0x13a   : > { %3171 = vmatprep.subr.bf16.mxu0 %v4114_v12  ;;  %v4166_v12 = vld [vmem:[%s4958_s18 + $0x464] ss:$8 sps:$4 sm:$0xff]   ;;  %3322 = vperm.xlu0 %3971, %v3319_v8   ;;  %v4226_v59 = vld [vmem:[%s4958_s18 + $0x500] ss:$8 sps:$4 sm:$0xff]   ;;  %v4237_v8 = vld [vmem:[%s4958_s18 + $0x530] ss:$8 sps:$4 sm:$0xff]  }
 0x13b   : > { %1870 = vmatpush1.bf16.msra.mxu1 %v1731_v0  ;;  %v4143_v0 = vld [vmem:[%s4958_s18 + $0x20] ss:$8 sps:$4 sm:$0xff]  }
 0x13c   : > { %1871 = vmatprep.subr.bf16.mxu1 %v1734_v3  ;;  %v4154_v3 = vld [vmem:[%s4958_s18 + $0x444] ss:$8 sps:$4 sm:$0xff]  }
 0x13d   : > { %3172 = vmatpush1.bf16.msra.mxu0 %v4112_v15  ;;  %v4164_v15 = vld [vmem:[%s4958_s18 + $0x460] ss:$8 sps:$4 sm:$0xff]  }
 0x13e   : > { %3173 = vmatprep.subr.bf16.mxu0 %v4117_v21  ;;  %3314 = vperm.xlu0 %3971, %v3311_v13   ;;  %v4175_v21 = vld [vmem:[%s4958_s18 + $0x74] ss:$8 sps:$4 sm:$0xff]   ;;  %v4258_v13 = vld [vmem:[%s4958_s18 + $0x630] ss:$8 sps:$4 sm:$0xff]  }
 0x13f   : > { %1872 = vmatpush1.bf16.msra.mxu1 %v1733_v7  ;;  %v4160_v7 = vld [vmem:[%s4958_s18 + $0x454] ss:$8 sps:$4 sm:$0xff]  }
 0x140   : > { %1873 = vmatprep.subr.bf16.mxu1 %v1736_v11  ;;  %v4163_v11 = vld [vmem:[%s4958_s18 + $0x54] ss:$8 sps:$4 sm:$0xff]  }
 0x141   : > { %3174 = vmatpush1.bf16.msra.mxu0 %v4115_v26  ;;  %v4176_v26 = vld [vmem:[%s4958_s18 + $0x480] ss:$8 sps:$4 sm:$0xff]  }
 0x142   : > { %3175 = vmatprep.subr.bf16.mxu0 %v4120_v31  ;;  %v4187_v31 = vld [vmem:[%s4958_s18 + $0x94] ss:$8 sps:$4 sm:$0xff]  }
 0x143   : > { %1874 = vmatpush1.bf16.msra.mxu1 %v1735_v17  ;;  %v4172_v17 = vld [vmem:[%s4958_s18 + $0x474] ss:$8 sps:$4 sm:$0xff]  }
 0x144   : > { %1875 = vmatprep.subr.bf16.mxu1 %v1738_v19  ;;  %v4170_v19 = vld [vmem:[%s4958_s18 + $0x470] ss:$8 sps:$4 sm:$0xff]  }
 0x145   : > { %3176 = vmatpush1.bf16.msra.mxu0 %v4118_v34  ;;  %v4188_v34 = vld [vmem:[%s4958_s18 + $0x4a0] ss:$8 sps:$4 sm:$0xff]  }
 0x146   : > { %3177 = vmatprep.subr.bf16.mxu0 %v4123_v40  ;;  %v4199_v40 = vld [vmem:[%s4958_s18 + $0xb4] ss:$8 sps:$4 sm:$0xff]  }
 0x147   : > { %1876 = vmatpush1.bf16.msra.mxu1 %v1737_v28  ;;  %v4184_v28 = vld [vmem:[%s4958_s18 + $0x494] ss:$8 sps:$4 sm:$0xff]  }
 0x148   : > { %1877 = vmatprep.subr.bf16.mxu1 %v1740_v30  ;;  %v4182_v30 = vld [vmem:[%s4958_s18 + $0x490] ss:$8 sps:$4 sm:$0xff]  }
 0x149   : > { %3178 = vmatpush1.bf16.msra.mxu0 %v4121_v42  ;;  %v4200_v42 = vld [vmem:[%s4958_s18 + $0x4c0] ss:$8 sps:$4 sm:$0xff]  }
 0x14a   : > { %3188 = vmatprep.subr.bf16.mxu0 %v4128_v47  ;;  %v4211_v47 = vld [vmem:[%s4958_s18 + $0xd4] ss:$8 sps:$4 sm:$0xff]  }
 0x14b   : > { %1878 = vmatpush1.bf16.msra.mxu1 %v1739_v37  ;;  %v4196_v37 = vld [vmem:[%s4958_s18 + $0x4b4] ss:$8 sps:$4 sm:$0xff]  }
 0x14c   : > { %1879 = vmatprep.subr.bf16.mxu1 %v1742_v39  ;;  %3180 = vmatmul.mubr.bf16.vlgmr.msra.gmra.mrb[0].mxu0 %v3597_v48  ;;  %v4194_v39 = vld [vmem:[%s4958_s18 + $0x4b0] ss:$8 sps:$4 sm:$0xff]   ;;  %v4214_v48 = vld [vmem:[%s4958_s18 + $0x4e4] ss:$8 sps:$4 sm:$0xff]  }
 0x14d   : > { %3189 = vmatpush1.bf16.msra.mxu0 %v4126_v50  ;;  %3220 = vmatprep.mubr.bf16.mxu0 %v3600_v55  ;;  %v4209_v50 = vld [vmem:[%s4958_s18 + $0xd0] ss:$8 sps:$4 sm:$0xff]  }
 0x14e   : > { %3190 = vmatprep.subr.bf16.mxu0 %v4136_v25  ;;  %v4220_v25 = vld [vmem:[%s4958_s18 + $0x4f4] ss:$8 sps:$4 sm:$0xff]   ;;  %v4218_v55 = vld [vmem:[%s4958_s18 + $0x4f0] ss:$8 sps:$4 sm:$0xff]  }
 0x14f   : > { %1880 = vmatpush1.bf16.msra.mxu1 %v1741_v44  ;;  %v4208_v44 = vld [vmem:[%s4958_s18 + $0x4d4] ss:$8 sps:$4 sm:$0xff]  }
 0x150   : > { %1881 = vmatprep.subr.bf16.mxu1 %v1744_v46  ;;  %v4206_v46 = vld [vmem:[%s4958_s18 + $0x4d0] ss:$8 sps:$4 sm:$0xff]  }
 0x151   : > { %3191 = vmatpush1.bf16.msra.mxu0 %v4134_v56  ;;  %v4228_v56 = vld [vmem:[%s4958_s18 + $0x504] ss:$8 sps:$4 sm:$0xff]  }
 0x152   : > { %3192 = vmatprep.subr.bf16.mxu0 %v4142_v20  ;;  %v5383_v20 = vld [vmem:[%s5613_s2 + $0x28] sm:$0xff] }
 0x153   : > { %1882 = vmatpush1.bf16.msra.mxu1 %v1743_v51  ;;  %v4212_v51 = vld [vmem:[%s4958_s18 + $0x4e0] ss:$8 sps:$4 sm:$0xff]  }
 0x154   : > { %3024 = vmatprep.subr.bf16.mxu1 %v4133_v52  ;;  %v4217_v52 = vld [vmem:[%s4958_s18 + $0xe4] ss:$8 sps:$4 sm:$0xff]  }
 0x155   : > { %3193 = vmatpush1.bf16.msra.mxu0 %v4140_v61  ;;  %v4242_v61 = vld [vmem:[%s4958_s18 + $0x604] ss:$8 sps:$4 sm:$0xff]  }
 0x156   : > { %1884 = vmatmul.mubr.bf16.vlgmr.msra.gmra.mrb[0].mxu1 %v3589_v49  ;;  %3194 = vmatprep.subr.bf16.mxu0 %v4148_v63  ;;  %v4223_v49 = vld [vmem:[%s4958_s18 + $0xf4] ss:$8 sps:$4 sm:$0xff]  }
 0x157   : > { %3025 = vmatpush1.bf16.msra.mxu1 %v4131_v54  ;;  %3056 = vmatprep.mubr.bf16.mxu1 %v3592_v53  ;;  %v4215_v54 = vld [vmem:[%s4958_s18 + $0xe0] ss:$8 sps:$4 sm:$0xff]   ;;  %v4221_v53 = vld [vmem:[%s4958_s18 + $0xf0] ss:$8 sps:$4 sm:$0xff]  }
 0x158   : > { %3026 = vmatprep.subr.bf16.mxu1 %v4139_v58  ;;  %v3599_v58 = vcombine.low %v5297_v35, %v5297_v35  ;;  %v3602_v35 = vcombine.high %v5383_v20, %v5383_v20  ;;  %v5396_v63 = vld [vmem:[%s5613_s2 + $0x30] sm:$0xff] }
 0x159   : > { %3195 = vmatpush1.bf16.msra.mxu0 %v4146_v1  ;;  %v4240_v1 = vld [vmem:[%s4958_s18 + $0x600] ss:$8 sps:$4 sm:$0xff]  }
 0x15a   : > { %3196 = vmatprep.subr.bf16.mxu0 %v4154_v3  ;;  %v4248_v3 = vld [vmem:[%s4958_s18 + $0x614] ss:$8 sps:$4 sm:$0xff]  }
 0x15b   : > { %3027 = vmatpush1.bf16.msra.mxu1 %v4137_v60  ;;  %v4233_v60 = vld [vmem:[%s4958_s18 + $0x514] ss:$8 sps:$4 sm:$0xff]  }
 0x15c   : > { %3028 = vmatprep.subr.bf16.mxu1 %v4145_v62  ;;  %v3591_v62 = vcombine.low %v5310_v57, %v5310_v57  ;;  %v3604_v57 = vcombine.high %v5396_v63, %v5396_v63 }
 0x15d   : > { %3197 = vmatpush1.bf16.msra.mxu0 %v4152_v5  ;;  %v4246_v5 = vld [vmem:[%s4958_s18 + $0x610] ss:$8 sps:$4 sm:$0xff]  }
 0x15e   : > { %3198 = vmatprep.subr.bf16.mxu0 %v4160_v7  ;;  %v4254_v7 = vld [vmem:[%s4958_s18 + $0x624] ss:$8 sps:$4 sm:$0xff]  }
 0x15f   : > { %3029 = vmatpush1.bf16.msra.mxu1 %v4143_v0  ;;  %v4231_v0 = vld [vmem:[%s4958_s18 + $0x510] ss:$8 sps:$4 sm:$0xff]  }
 0x160   : > { %3030 = vmatprep.subr.bf16.mxu1 %v4151_v2  ;;  %v4236_v2 = vld [vmem:[%s4958_s18 + $0x524] ss:$8 sps:$4 sm:$0xff]  }
 0x161   : > { %3199 = vmatpush1.bf16.msra.mxu0 %v4158_v10  ;;  %v4245_v10 = vld [vmem:[%s4958_s18 + $0x544] ss:$8 sps:$4 sm:$0xff]  }
 0x162   : > { %3200 = vmatprep.subr.bf16.mxu0 %v4166_v12  ;;  %v4243_v12 = vld [vmem:[%s4958_s18 + $0x540] ss:$8 sps:$4 sm:$0xff]  }
 0x163   : > { %3031 = vmatpush1.bf16.msra.mxu1 %v4149_v4  ;;  %v4234_v4 = vld [vmem:[%s4958_s18 + $0x520] ss:$8 sps:$4 sm:$0xff]  }
 0x164   : > { %3032 = vmatprep.subr.bf16.mxu1 %v4157_v6  ;;  %v4239_v6 = vld [vmem:[%s4958_s18 + $0x534] ss:$8 sps:$4 sm:$0xff]  }
 0x165   : > { %3201 = vmatpush1.bf16.msra.mxu0 %v4164_v15  ;;  %v4266_v15 = vld [vmem:[%s4958_s18 + $0x644] ss:$8 sps:$4 sm:$0xff]  }
 0x166   : > { %3202 = vmatprep.subr.bf16.mxu0 %v4172_v17  ;;  %v4264_v17 = vld [vmem:[%s4958_s18 + $0x640] ss:$8 sps:$4 sm:$0xff]  }
 0x167   : > { %3033 = vmatpush1.bf16.msra.mxu1 %v4155_v9  ;;  %v4252_v9 = vld [vmem:[%s4958_s18 + $0x620] ss:$8 sps:$4 sm:$0xff]  }
 0x168   : > { %3034 = vmatprep.subr.bf16.mxu1 %v4163_v11  ;;  %v4260_v11 = vld [vmem:[%s4958_s18 + $0x634] ss:$8 sps:$4 sm:$0xff]  }
 0x169   : > { %3203 = vmatpush1.bf16.msra.mxu0 %v4170_v19  ;;  %v4272_v19 = vld [vmem:[%s4958_s18 + $0x654] ss:$8 sps:$4 sm:$0xff]  }
 0x16a   : > { %3204 = vmatprep.subr.bf16.mxu0 %v4178_v22  ;;  %v4270_v22 = vld [vmem:[%s4958_s18 + $0x650] ss:$8 sps:$4 sm:$0xff]  }
 0x16b   : > { %3035 = vmatpush1.bf16.msra.mxu1 %v4161_v14  ;;  %v4251_v14 = vld [vmem:[%s4958_s18 + $0x554] ss:$8 sps:$4 sm:$0xff]  }
 0x16c   : > { %3036 = vmatprep.subr.bf16.mxu1 %v4169_v16  ;;  %v4249_v16 = vld [vmem:[%s4958_s18 + $0x550] ss:$8 sps:$4 sm:$0xff]  }
 0x16d   : > { %3205 = vmatpush1.bf16.msra.mxu0 %v4176_v26  ;;  %v4278_v26 = vld [vmem:[%s4958_s18 + $0x664] ss:$8 sps:$4 sm:$0xff]  }
 0x16e   : > { %3206 = vmatprep.subr.bf16.mxu0 %v4184_v28  ;;  %v4276_v28 = vld [vmem:[%s4958_s18 + $0x660] ss:$8 sps:$4 sm:$0xff]  }
 0x16f   : > { %3037 = vmatpush1.bf16.msra.mxu1 %v4167_v18  ;;  %v4257_v18 = vld [vmem:[%s4958_s18 + $0x564] ss:$8 sps:$4 sm:$0xff]  }
 0x170   : > { %3038 = vmatprep.subr.bf16.mxu1 %v4175_v21  ;;  %v4255_v21 = vld [vmem:[%s4958_s18 + $0x560] ss:$8 sps:$4 sm:$0xff]  }
 0x171   : > { %3207 = vmatpush1.bf16.msra.mxu0 %v4182_v30  ;;  %v4284_v30 = vld [vmem:[%s4958_s18 + $0x674] ss:$8 sps:$4 sm:$0xff]  }
 0x172   : > { %3208 = vmatprep.subr.bf16.mxu0 %v4190_v32  ;;  %v4282_v32 = vld [vmem:[%s4958_s18 + $0x670] ss:$8 sps:$4 sm:$0xff]  }
 0x173   : > { %3039 = vmatpush1.bf16.msra.mxu1 %v4173_v23  ;;  %v4263_v23 = vld [vmem:[%s4958_s18 + $0x574] ss:$8 sps:$4 sm:$0xff]  }
 0x174   : > { %3040 = vmatprep.subr.bf16.mxu1 %v4181_v27  ;;  %v4261_v27 = vld [vmem:[%s4958_s18 + $0x570] ss:$8 sps:$4 sm:$0xff]  }
 0x175   : > { %3209 = vmatpush1.bf16.msra.mxu0 %v4188_v34  ;;  %v4290_v34 = vld [vmem:[%s4958_s18 + $0x684] ss:$8 sps:$4 sm:$0xff]  }
 0x176   : > { %3210 = vmatprep.subr.bf16.mxu0 %v4196_v37  ;;  %v4288_v37 = vld [vmem:[%s4958_s18 + $0x680] ss:$8 sps:$4 sm:$0xff]  }
 0x177   : > { %3041 = vmatpush1.bf16.msra.mxu1 %v4179_v29  ;;  %v4269_v29 = vld [vmem:[%s4958_s18 + $0x584] ss:$8 sps:$4 sm:$0xff]  }
 0x178   : > { %3042 = vmatprep.subr.bf16.mxu1 %v4187_v31  ;;  %v4267_v31 = vld [vmem:[%s4958_s18 + $0x580] ss:$8 sps:$4 sm:$0xff]  }
 0x179   : > { %3211 = vmatpush1.bf16.msra.mxu0 %v4194_v39  ;;  %v4296_v39 = vld [vmem:[%s4958_s18 + $0x694] ss:$8 sps:$4 sm:$0xff]  }
 0x17a   : > { %3212 = vmatprep.subr.bf16.mxu0 %v4202_v41  ;;  %v4294_v41 = vld [vmem:[%s4958_s18 + $0x690] ss:$8 sps:$4 sm:$0xff]  }
 0x17b   : > { %3043 = vmatpush1.bf16.msra.mxu1 %v4185_v33  ;;  %v4275_v33 = vld [vmem:[%s4958_s18 + $0x594] ss:$8 sps:$4 sm:$0xff]  }
 0x17c   : > { %3044 = vmatprep.subr.bf16.mxu1 %v4193_v36  ;;  %v4273_v36 = vld [vmem:[%s4958_s18 + $0x590] ss:$8 sps:$4 sm:$0xff]  }
 0x17d   : > { %3213 = vmatpush1.bf16.msra.mxu0 %v4200_v42  ;;  %v4302_v42 = vld [vmem:[%s4958_s18 + $0x6a4] ss:$8 sps:$4 sm:$0xff]  }
 0x17e   : > { %3214 = vmatprep.subr.bf16.mxu0 %v4208_v44  ;;  %v4300_v44 = vld [vmem:[%s4958_s18 + $0x6a0] ss:$8 sps:$4 sm:$0xff]  }
 0x17f   : > { %3045 = vmatpush1.bf16.msra.mxu1 %v4191_v38  ;;  %v4281_v38 = vld [vmem:[%s4958_s18 + $0x5a4] ss:$8 sps:$4 sm:$0xff]  }
 0x180   : > { %3046 = vmatprep.subr.bf16.mxu1 %v4199_v40  ;;  %v4279_v40 = vld [vmem:[%s4958_s18 + $0x5a0] ss:$8 sps:$4 sm:$0xff]  }
 0x181   : > { %3215 = vmatpush1.bf16.msra.mxu0 %v4206_v46  ;;  %v4308_v46 = vld [vmem:[%s4958_s18 + $0x6b4] ss:$8 sps:$4 sm:$0xff]  }
 0x182   : > { %3216 = vmatprep.subr.bf16.mxu0 %v4214_v48  ;;  %v4306_v48 = vld [vmem:[%s4958_s18 + $0x6b0] ss:$8 sps:$4 sm:$0xff]  }
 0x183   : > { %3047 = vmatpush1.bf16.msra.mxu1 %v4197_v24  ;;  %v4287_v24 = vld [vmem:[%s4958_s18 + $0x5b4] ss:$8 sps:$4 sm:$0xff]  }
 0x184   : > { %3048 = vmatprep.subr.bf16.mxu1 %v4205_v43  ;;  %v4285_v43 = vld [vmem:[%s4958_s18 + $0x5b0] ss:$8 sps:$4 sm:$0xff]  }
 0x185   : > { %3217 = vmatpush1.bf16.msra.mxu0 %v4212_v51  ;;  %v3603_v51 = vcombine.low %v5396_v63, %v5396_v63 }
 0x186   : > { %3218 = vmatprep.subr.bf16.mxu0 %v4220_v25  ;;  %v4305_v25 = vld [vmem:[%s4958_s18 + $0x5e4] ss:$8 sps:$4 sm:$0xff]  }
 0x187   : > { %3049 = vmatpush1.bf16.msra.mxu1 %v4203_v45  ;;  %v4293_v45 = vld [vmem:[%s4958_s18 + $0x5c4] ss:$8 sps:$4 sm:$0xff]  }
 0x188   : > { %3050 = vmatprep.subr.bf16.mxu1 %v4211_v47  ;;  %v4291_v47 = vld [vmem:[%s4958_s18 + $0x5c0] ss:$8 sps:$4 sm:$0xff]  }
 0x189   : > { %3219 = vmatpush1.bf16.msra.mxu0 %v4218_v55  ;;  %v4311_v55 = vld [vmem:[%s4958_s18 + $0x5f4] ss:$8 sps:$4 sm:$0xff]  }
 0x18a   : > { %3229 = vmatprep.subr.bf16.mxu0 %v4228_v56  ;;  %v3601_v56 = vcombine.low %v5383_v20, %v5383_v20 }
 0x18b   : > { %3051 = vmatpush1.bf16.msra.mxu1 %v4209_v50  ;;  %v4299_v50 = vld [vmem:[%s4958_s18 + $0x5d4] ss:$8 sps:$4 sm:$0xff]  }
 0x18c   : > { %3052 = vmatprep.subr.bf16.mxu1 %v4217_v52  ;;  %3221 = vmatmul.mubr.bf16.vlgmr.msra.gmra.mrb[0].mxu0 %v3599_v58  ;;  %v4297_v52 = vld [vmem:[%s4958_s18 + $0x5d0] ss:$8 sps:$4 sm:$0xff]   ;;  %v3367_v58 = vld [vmem:[%s5616_s5 + $0x80] sm:$0xff] }
 0x18d   : > { %3230 = vmatpush1.bf16.msra.mxu0 %v4226_v59  ;;  %3261 = vmatprep.mubr.bf16.mxu0 %v3602_v35  ;;  %v3369_v35 = vld [vmem:[%s5616_s5 + $0x90] sm:$0xff] }
 0x18e   : > { %3231 = vmatprep.subr.bf16.mxu0 %v4233_v60  ;;  %v3351_v60 = vld [vmem:[%s5616_s5] sm:$0xff] }
 0x18f   : > { %3053 = vmatpush1.bf16.msra.mxu1 %v4215_v54  ;;  %v4303_v54 = vld [vmem:[%s4958_s18 + $0x5e0] ss:$8 sps:$4 sm:$0xff]  }
 0x190   : > { %3054 = vmatprep.subr.bf16.mxu1 %v4223_v49  ;;  %v4309_v49 = vld [vmem:[%s4958_s18 + $0x5f0] ss:$8 sps:$4 sm:$0xff]  }
 0x191   : > { %3232 = vmatpush1.bf16.msra.mxu0 %v4231_v0  ;;  %v3353_v0 = vld [vmem:[%s5616_s5 + $0x10] sm:$0xff] }
 0x192   : > { %3233 = vmatprep.subr.bf16.mxu0 %v4236_v2 }
 0x193   : > { %3055 = vmatpush1.bf16.msra.mxu1 %v4221_v53  ;;  %v3368_v53 = vld [vmem:[%s5616_s5 + $0x88] sm:$0xff] }
 0x194   : > { %3270 = vmatprep.subr.bf16.mxu1 %v4242_v61  ;;  %v3864_v59 = vpack.c.bf16 %v3368_v53, %v3367_v58  ;;  %v3352_v61 = vld [vmem:[%s5616_s5 + $0x8] sm:$0xff] }
 0x195   : > { %3234 = vmatpush1.bf16.msra.mxu0 %v4234_v4  ;;  %v3866_v20 = vpack.c.bf16 %v3352_v61, %v3351_v60 }
 0x196   : > { %3057 = vmatmul.mubr.bf16.vlgmr.msra.gmra.mrb[0].mxu1 %v3591_v62  ;;  %3235 = vmatprep.subr.bf16.mxu0 %v4239_v6  ;;  %v3370_v62 = vld [vmem:[%s5616_s5 + $0x98] sm:$0xff]  ;;  %v3356_v6 = vld [vmem:[%s5616_s5 + $0x28] sm:$0xff] }
 0x197   : > { %3271 = vmatpush1.bf16.msra.mxu1 %v4240_v1  ;;  %3821 = vmatprep.mubr.msk.bf16.mxu1 %vm3020_vm0, %v3604_v57  ;;  %v3868_v63 = vpack.c.bf16 %v3370_v62, %v3369_v35  ;;  %v3354_v1 = vld [vmem:[%s5616_s5 + $0x18] sm:$0xff]  ;;  %v3372_v57 = vld [vmem:[%s5616_s5 + $0xa8] sm:$0xff] }
 0x198   : > { %3272 = vmatprep.subr.bf16.mxu1 %v4248_v3  ;;  %v3870_v2 = vpack.c.bf16 %v3354_v1, %v3353_v0  ;;  %v3371_v3 = vld [vmem:[%s5616_s5 + $0xa0] sm:$0xff] }
 0x199   : > { %3236 = vmatpush1.bf16.msra.mxu0 %v4237_v8  ;;  %v3872_v4 = vpack.c.bf16 %v3372_v57, %v3371_v3  ;;  %v3373_v8 = vld [vmem:[%s5616_s5 + $0xb0] sm:$0xff] }
 0x19a   : > { %3237 = vmatprep.subr.bf16.mxu0 %v4245_v10 }
 0x19b   : > { %3273 = vmatpush1.bf16.msra.mxu1 %v4246_v5  ;;  %v3355_v5 = vld [vmem:[%s5616_s5 + $0x20] sm:$0xff] }
 0x19c   : > { %3274 = vmatprep.subr.bf16.mxu1 %v4254_v7  ;;  %v3874_v7 = vpack.c.bf16 %v3356_v6, %v3355_v5 }
 0x19d   : > { %3238 = vmatpush1.bf16.msra.mxu0 %v4243_v12  ;;  %v3358_v12 = vld [vmem:[%s5616_s5 + $0x38] sm:$0xff] }
 0x19e   : > { %3239 = vmatprep.subr.bf16.mxu0 %v4251_v14  ;;  %v3375_v14 = vld [vmem:[%s5616_s5 + $0xc0] sm:$0xff] }
 0x19f   : > { %3275 = vmatpush1.bf16.msra.mxu1 %v4252_v9  ;;  %v3374_v9 = vld [vmem:[%s5616_s5 + $0xb8] sm:$0xff] }
 0x1a0   : > { %3276 = vmatprep.subr.bf16.mxu1 %v4260_v11  ;;  %v3876_v10 = vpack.c.bf16 %v3374_v9, %v3373_v8  ;;  %v3357_v11 = vld [vmem:[%s5616_s5 + $0x30] sm:$0xff] }
 0x1a1   : > { %3240 = vmatpush1.bf16.msra.mxu0 %v4249_v16 }
 0x1a2   : > { %3241 = vmatprep.subr.bf16.mxu0 %v4257_v18  ;;  %v3360_v18 = vld [vmem:[%s5616_s5 + $0x48] sm:$0xff] }
 0x1a3   : > { %3277 = vmatpush1.bf16.msra.mxu1 %v4258_v13  ;;  %v3878_v13 = vpack.c.bf16 %v3358_v12, %v3357_v11  ;;  %v3822_v12 = vld [vmem:[%s5617_s6] ss:$0 sm:$0xff] }
 0x1a4   : > { %3278 = vmatprep.subr.bf16.mxu1 %v4266_v15  ;;  %v3376_v15 = vld [vmem:[%s5616_s5 + $0xc8] sm:$0xff] }
 0x1a5   : > { %3242 = vmatpush1.bf16.msra.mxu0 %v4255_v21  ;;  %v3880_v16 = vpack.c.bf16 %v3376_v15, %v3375_v14  ;;  %v3377_v21 = vld [vmem:[%s5616_s5 + $0xd0] sm:$0xff] }
 0x1a6   : > { %3243 = vmatprep.subr.bf16.mxu0 %v4263_v23 }
 0x1a7   : > { %3279 = vmatpush1.bf16.msra.mxu1 %v4264_v17  ;;  %v3359_v17 = vld [vmem:[%s5616_s5 + $0x40] sm:$0xff] }
 0x1a8   : > { %3280 = vmatprep.subr.bf16.mxu1 %v4272_v19  ;;  %v3882_v19 = vpack.c.bf16 %v3360_v18, %v3359_v17 }
 0x1a9   : > { %3244 = vmatpush1.bf16.msra.mxu0 %v4261_v27  ;;  %v3362_v27 = vld [vmem:[%s5616_s5 + $0x58] sm:$0xff] }
 0x1aa   : > { %3245 = vmatprep.subr.bf16.mxu0 %v4269_v29  ;;  %v3379_v29 = vld [vmem:[%s5616_s5 + $0xe0] sm:$0xff] }
 0x1ab   : > { %3281 = vmatpush1.bf16.msra.mxu1 %v4270_v22  ;;  %v3378_v22 = vld [vmem:[%s5616_s5 + $0xd8] sm:$0xff] }
 0x1ac   : > { %3282 = vmatprep.subr.bf16.mxu1 %v4278_v26  ;;  %v3884_v23 = vpack.c.bf16 %v3378_v22, %v3377_v21  ;;  %v3361_v26 = vld [vmem:[%s5616_s5 + $0x50] sm:$0xff]  ;;  %v3466_v21 = vld [vmem:[%s1232_s26] sm:$0x1] }
 0x1ad   : > { %3246 = vmatpush1.bf16.msra.mxu0 %v4267_v31 }
 0x1ae   : > { %3247 = vmatprep.subr.bf16.mxu0 %v4275_v33  ;;  %v3364_v33 = vld [vmem:[%s5616_s5 + $0x68] sm:$0xff] }
 0x1af   : > { %3283 = vmatpush1.bf16.msra.mxu1 %v4276_v28  ;;  %v3886_v28 = vpack.c.bf16 %v3362_v27, %v3361_v26 }
 0x1b0   : > { %3284 = vmatprep.subr.bf16.mxu1 %v4284_v30  ;;  %v3380_v30 = vld [vmem:[%s5616_s5 + $0xe8] sm:$0xff] }
 0x1b1   : > { %3248 = vmatpush1.bf16.msra.mxu0 %v4273_v36  ;;  %v3888_v31 = vpack.c.bf16 %v3380_v30, %v3379_v29  ;;  %v3381_v36 = vld [vmem:[%s5616_s5 + $0xf0] sm:$0xff] }
 0x1b2   : > { %3249 = vmatprep.subr.bf16.mxu0 %v4281_v38 }
 0x1b3   : > { %3285 = vmatpush1.bf16.msra.mxu1 %v4282_v32  ;;  %v3363_v32 = vld [vmem:[%s5616_s5 + $0x60] sm:$0xff] }
 0x1b4   : > { %3286 = vmatprep.subr.bf16.mxu1 %v4290_v34  ;;  %v3890_v34 = vpack.c.bf16 %v3364_v33, %v3363_v32 }
 0x1b5   : > { %3250 = vmatpush1.bf16.msra.mxu0 %v4279_v40  ;;  %v3366_v40 = vld [vmem:[%s5616_s5 + $0x78] sm:$0xff] }
 0x1b6   : > { %3251 = vmatprep.subr.bf16.mxu0 %v4287_v24 }
 0x1b7   : > { %3287 = vmatpush1.bf16.msra.mxu1 %v4288_v37  ;;  %v3382_v37 = vld [vmem:[%s5616_s5 + $0xf8] sm:$0xff] }
 0x1b8   : > { %3288 = vmatprep.subr.bf16.mxu1 %v4296_v39  ;;  %v3892_v38 = vpack.c.bf16 %v3382_v37, %v3381_v36  ;;  %v3365_v39 = vld [vmem:[%s5616_s5 + $0x70] sm:$0xff] }
 0x1b9   : > { %3252 = vmatpush1.bf16.msra.mxu0 %v4285_v43 }
 0x1ba   : > { %3253 = vmatprep.subr.bf16.mxu0 %v4293_v45 }
 0x1bb   : > { %3289 = vmatpush1.bf16.msra.mxu1 %v4294_v41  ;;  %v3894_v41 = vpack.c.bf16 %v3366_v40, %v3365_v39 }
 0x1bc   : > { %3290 = vmatprep.subr.bf16.mxu1 %v4302_v42 }
 0x1bd   : > { %3254 = vmatpush1.bf16.msra.mxu0 %v4291_v47 }
 0x1be   : > { %3255 = vmatprep.subr.bf16.mxu0 %v4299_v50  ;;  %v3323_v50 = vpop.permute.xlu0 %3322 }
 0x1bf   : > { %3291 = vmatpush1.bf16.msra.mxu1 %v4300_v44 }
 0x1c0   : > { %3292 = vmatprep.subr.bf16.mxu1 %v4308_v46 }
 0x1c1   : > { %3256 = vmatpush1.bf16.msra.mxu0 %v4297_v52  ;;  %v3324_v52 = vrot.slane %v3323_v50, 7 }
 0x1c2   : > { %3257 = vmatprep.subr.bf16.mxu0 %v4305_v25  ;;  %v3315_v57 = vpop.permute.xlu0 %3314 }
 0x1c3   : > { %3293 = vmatpush1.bf16.msra.mxu1 %v4306_v48 }
 0x1c4   : > { %3865 = vmatprep.subr.bf16.mxu1 %v3864_v59 }
 0x1c5   : > { %3258 = vmatpush1.bf16.msra.mxu0 %v4303_v54 }
 0x1c6   : > { %3303 = vmatmul.mubr.bf16.vlgmr.msra.gmra.mrb[4].mxu1 %v3603_v51  ;;  %3259 = vmatprep.subr.bf16.mxu0 %v4311_v55 }
 0x1c7   : > { %3867 = vmatpush3.bf16.msra.mxu1 %v3866_v20 }
 0x1c8   : > { %3869 = vmatprep.subr.bf16.mxu1 %v3868_v63 }
 0x1c9   : > { %3260 = vmatpush1.bf16.msra.mxu0 %v4309_v49 }
 0x1cb   : > { %3871 = vmatpush3.bf16.msra.mxu1 %v3870_v2 }
 0x1cc   : > { %3262 = vmatmul.mubr.bf16.vlgmr.msra.gmra.mrb[0].mxu0 %v3601_v56  ;;  %3873 = vmatprep.subr.bf16.mxu1 %v3872_v4 }
 0x1cf   : > { %3875 = vmatpush3.bf16.msra.mxu1 %v3874_v7 }
 0x1d0   : > { %3877 = vmatprep.subr.bf16.mxu1 %v3876_v10 }
 0x1d3   : > { %3879 = vmatpush3.bf16.msra.mxu1 %v3878_v13 }
 0x1d4   : > { %3881 = vmatprep.subr.bf16.mxu1 %v3880_v16 }
 0x1d7   : > { %3883 = vmatpush3.bf16.msra.mxu1 %v3882_v19 }
 0x1d8   : > { %3885 = vmatprep.subr.bf16.mxu1 %v3884_v23 }
 0x1db   : > { %3887 = vmatpush3.bf16.msra.mxu1 %v3886_v28 }
 0x1dc   : > { %3889 = vmatprep.subr.bf16.mxu1 %v3888_v31 }
 0x1df   : > { %3891 = vmatpush3.bf16.msra.mxu1 %v3890_v34 }
 0x1e0   : > { %3893 = vmatprep.subr.bf16.mxu1 %v3892_v38 }
 0x1e3   : > { %3895 = vmatpush3.bf16.msra.mxu1 %v3894_v41 }
 0x269   : > { %v3058_v24 = vpop.f32.mrb[0].mxu1 }
 0x26a   : > { %v3060_v42 = vpop.f32.mrb[1].mxu1 }
 0x26b   : > { %v3062_v43 = vpop.f32.mrb[2].mxu1 }
 0x26c   : > { %v3063_v44 = vpop.f32.mrb[3].mxu1 }
 0x299   : > { %v3304_v45 = vpop.f32.mrb[4].mxu1 }
 0x29a   : > { %v3306_v46 = vpop.f32.mrb[5].mxu1 }
 0x29b   : > { %v3308_v47 = vpop.f32.mrb[6].mxu1 }
 0x29c   : > { %v3309_v48 = vpop.f32.mrb[7].mxu1 }
 0x29f   : > { %v3263_v51 = vpop.f32.mrb[0].mxu0 }
 0x2a0   : > { %v3896_v25 = vadd.f32 %v3263_v51, %v3058_v24  ;;  %v3265_v54 = vpop.f32.mrb[1].mxu0 }
 0x2a1   : > { %v3898_v55 = vadd.f32 %v3265_v54, %v3060_v42  ;;  %v3267_v49 = vpop.f32.mrb[2].mxu0 }
 0x2a2   : > { %v3897_v56 = vadd.f32 %v3896_v25, %v3304_v45  ;;  %v3268_v58 = vpop.f32.mrb[3].mxu0 }
 0x2a3   : > { %v3899_v53 = vadd.f32 %v3898_v55, %v3306_v46 }
 0x2a4   : > { %v3326_v59 = vadd.f32 %v3897_v56, %v3324_v52  ;;  %v3317_v8 = vadd.f32 %v3897_v56, %v3315_v57 }
 0x2a5   : > { %v3327_v60 = vadd.f32 %v3899_v53, %v3324_v52  ;;  %v3318_v6 = vadd.f32 %v3899_v53, %v3315_v57 }
 0x2a6   : > { %v3328_v61 = vsub.f32 0.0, %v3326_v59 }
 0x2a7   : > { %v3329_v20 = vsub.f32 0.0, %v3327_v60 }
 0x2a8   : > { %v3330_v35 = vmul.f32 1.442695, %v3328_v61 }
 0x2a9   : > { %v3332_v62 = vmul.f32 1.442695, %v3329_v20 }
 0x2aa   : > { %4316 = vpow2.f32 %v3330_v35 }
 0x2ab   : > { %4318 = vpow2.f32 %v3332_v62 }
 0x2b4   : > { %v4317_v63 = vpop.eup %4316 }
 0x2b5   : > { %v4319_v0 = vpop.eup %4318  ;;  %v3334_v1 = vadd.f32 1.0, %v4317_v63 }
 0x2b6   : > { %v3335_v2 = vadd.f32 1.0, %v4319_v0 }
 0x2b7   : > { %4320 = vrcp.f32 %v3334_v1 }
 0x2b8   : > { %4322 = vrcp.f32 %v3335_v2 }
 0x2c1   : > { %v4321_v3 = vpop.eup %4320 }
 0x2c2   : > { %v4323_v4 = vpop.eup %4322  ;;  %v3342_v5 = vrot.slane %v4321_v3, 1 }
 0x2c3   : > { %v3343_v7 = vrot.slane %v4323_v4, 1 }
 0x2c4   : > { %v3346_v10 = vmul.f32 %v3342_v5, %v3317_v8 }
 0x2c5   : > { %v3347_v9 = vmul.f32 %v3343_v7, %v3318_v6 }
 0x2c7   : > { %3823 = vmatprep.mubr.msk.f32.mxu1 %vm3348_vm1, %v3347_v9 }
 0x2c8   : > { %3824 = vmatmul.mubr.msk.f32.vlgmr.msra.gmra.mrb[8].mxu1 %vm3348_vm1, %v3346_v10 }
 0x39b   : > { %v3861_v11 = vpop.f32.mrb[8].mxu1 }
 0x39c   : > { %v3862_v13 = vpop.f32.mrb[9].mxu1 }
 0x39d   : > { %v3863_v14 = vadd.f32 %v3862_v13, %v3861_v11 }
 0x39f   : > { %v3457_v15 = vadd.f32 %v3863_v14, %v3822_v12 }
 0x3a1   : > { %v3460_v16 = vsub.f32 0.0, %v3457_v15 }
 0x3a3   : > { %v3461_v17 = vmul.f32 1.442695, %v3460_v16 }
 0x3a5   : > { %4324 = vpow2.f32 %v3461_v17 }
 0x3af   : > { %v4325_v18 = vpop.eup %4324 }
 0x3b0   : > { %v3463_v19 = vadd.f32 1.0, %v4325_v18 }
 0x3b2   : > { %4326 = vrcp.f32 %v3463_v19 }
 0x3bc   : > { %v4327_v22 = vpop.eup %4326 }
 0x3bd   : > { %v3467_v23 = vmul.f32 %v4327_v22, %v3466_v21 }
 0x3bf   : > { %v3468_v26 = vmul.f32 %v3467_v23, %v3467_v23 }
 0x3c1   : > { %v3469_v27 = vsel %vm3348_vm1, %v3468_v26, 0.0 }
 0x3c2   : > { %3470 = vadd.xlane.f32.xlu1 %v3469_v27 }
 0x44f   : > { %v3471_v28 = vpop.xlane.xlu1 %3470 }
 0x450   : > { %4328 = vrsqrt.f32 %v3471_v28  ;;  %vm3474_vm2 = vcmp.eq.f32.partialorder %v3471_v28, inf  ;;  %v3477_v31 = vand.u32 2147483648, %v3471_v28  ;;  %vm3476_vm3 = vcmp.eq.f32.partialorder %v3471_v28, 0.0 }
 0x45a   : > { %v4329_v29 = vpop.eup %4328 }
 0x45b   : > { %v3473_v30 = vmul.f32 %v4329_v29, %v3471_v28 }
 0x45d   : > { %v3475_v32 = vsel %vm3474_vm2, %v3471_v28, %v3473_v30 }
 0x45e   : > { %v3478_v33 = vsel %vm3476_vm3, %v3477_v31, %v3475_v32 }
 0x45f   : > { %v3479_v34 = vadd.f32 1e-08, %v3478_v33 }
 0x461   : > { %4330 = vrcp.f32 %v3479_v34 }
 0x46b   : > { %v4331_v36 = vpop.eup %4330 }
 0x46c   : > { %v3481_v37 = vmul.f32 %v4331_v36, %v3467_v23 }
 0x46e   : > { %3482 = vst [vmem:[%s1223_s10] sm:$0x1] %v3481_v37 }
 0x46f   : > { %4345 = shalt.err (!%p4342_p7)
}
 0x470   : > { %s4346_s24 = scalar_lea.hbm %s5567_s19, 16  ;;  %s4350_s17 = scalar_lea.hbm %s5619_s8, 32 }
 0x471   : > { %p4347_p10 = scmp.ne.s32.totalorder %s5567_s19, %s4346_s24  ;;  %p4351_p13 = scmp.lt.u32.totalorder %s5567_s19, %s5619_s8 }
 0x472   : > { %p4352_p0 = scmp.lt.u32.totalorder %s4350_s17, %s4346_s24  ;;  %p4354_p2 = scmp.lt.u32.totalorder %s4346_s24, %s5567_s19 }
 0x473   : > { %p4348_p11 = pnand %p4347_p10, %p4482_p6 }
 0x474   : > { %p4353_p1 = por %p4352_p0, %p4351_p13 }
 0x475   : > { %p4349_p12 = pneg %p4348_p11 }
 0x476   : > { %p4355_p3 = por %p4354_p2, %p4353_p1 }
 0x478   : > { %p4356_p4 = pnand %p4355_p3, %p4349_p12 }
 0x47a   : > { %4359 = shalt.err (!%p4356_p4)
}
 0x47b   : > { %3931 = dma.vmem_to_hbm [thread:$0]  (%p4482_p6), %s5569_s12, 16, %s5567_s19, %s3484_s20  }
 0x47c PF: > { %s3508_s18 = sand.u32 1, %s4382_s27   ;;  %p3934_p5 = pnand %p3580_p9, %p4486_p8 }
 0x47d   : > { %s3509_s21 = scalar_lea.sflag [#allocation4], %s3508_s18 }
 0x47e   : > { %4377 = dma.done.wait (!%p3934_p5), %s3509_s21, 16  }
 0x47f   : > { %4379 = vsyncadd (!%p3934_p5), %s3509_s21, 4294967280  ;;  %p18_p7 = scmp.ge.s32.totalorder %s4468_s11, 4   ;;  %s5622_s27 = smov %s4386_s28 }
 0x480   : > { %s5623_s28 = smov %s4390_s29  ;;  %s5624_s29 = smov %s4480_s14 }
 0x481   : > { %s5625_s30 = smov %s4468_s11  ;;  %20 = sbr.rel (!%p18_p7) target bundleno = 3 (0x3), region = 136 }
 0x488   :  { %3513 = vsyncpa [#allocation4], 1 }
 0x489   :  { %3515 = vsyncpa [#allocation4 + $0x1], 1 }

</bundles_post_ra>
